<compile_context>
chip_gen: v6e
topology: v6e:2x2x1
jax: 0.10.0
libtpu: 0.0.40
codegen_flags: <defaults>
</compile_context>

<pallas_src>
import functools

import jax
import jax.numpy as jnp
from jax.experimental import pallas as pl
from jax.experimental.pallas import tpu as pltpu

H = 128  # hidden width fixed by the module (nn.Linear(..., 128))


def tvae_kernel(x_ref, eps_ref,
                ew1_ref, ew2_ref, ew3_ref,
                dw1_ref, dw2_ref, dw3_ref,
                b_ref,
                out_ref, *, matmul_dtype):
    # bias rows: 0=eb1 1=eb2 2=eb3_mu 3=eb3_logvar 4=db1 5=db2 6=db3 (f32)
    b = b_ref[...]
    eb1, eb2 = b[0:1, :], b[1:2, :]
    eb3m, eb3v = b[2:3, :], b[3:4, :]
    db1, db2, db3 = b[4:5, :], b[5:6, :], b[6:7, :]

    x = x_ref[...]                                   # [TB, 128], matmul_dtype

    # ---------------- encoder: Linear->ReLU->Linear->ReLU->head -------------
    h = jnp.dot(x, ew1_ref[...], preferred_element_type=jnp.float32) + eb1
    h = jnp.maximum(h, 0.0)
    h = jnp.dot(h.astype(matmul_dtype), ew2_ref[...],
                preferred_element_type=jnp.float32) + eb2
    h = jnp.maximum(h, 0.0)
    # fused mu|logvar head: one N=256 matmul (fills the 256-wide MXU), then
    # slice at lane 128 (vreg boundary).
    dist = jnp.dot(h.astype(matmul_dtype), ew3_ref[...],
                   preferred_element_type=jnp.float32)        # [TB, 256]
    mu = dist[:, :H] + eb3m
    logvar = dist[:, H:] + eb3v

    # ------------- reparameterization (f32): z = mu + exp(0.5*logvar)*eps ---
    # eps is zero beyond latent_dim, so z's padded lanes are exactly 0.
    z = mu + jnp.exp(0.5 * logvar) * eps_ref[...].astype(jnp.float32)

    # ---------------- decoder: Linear->ReLU->Linear->ReLU->Linear -----------
    g = jnp.dot(z.astype(matmul_dtype), dw1_ref[...],
                preferred_element_type=jnp.float32) + db1
    g = jnp.maximum(g, 0.0)
    g = jnp.dot(g.astype(matmul_dtype), dw2_ref[...],
                preferred_element_type=jnp.float32) + db2
    g = jnp.maximum(g, 0.0)
    xhat = jnp.dot(g.astype(matmul_dtype), dw3_ref[...],
                   preferred_element_type=jnp.float32) + db3

    # lane-dense packed output slab: [mu | logvar | z | xhat], 128 lanes each,
    # stored in the (narrow) out dtype -> halves the dominant HBM write.
    od = out_ref.dtype
    out_ref[:, 0 * H:1 * H] = mu.astype(od)
    out_ref[:, 1 * H:2 * H] = logvar.astype(od)
    out_ref[:, 2 * H:3 * H] = z.astype(od)
    out_ref[:, 3 * H:4 * H] = xhat.astype(od)


def _round_up(n, m):
    return (n + m - 1) // m * m


def tvae_forward(x, eps, params, *, latent_dim, tile_b=1024,
                 matmul_dtype=jnp.bfloat16, out_dtype=jnp.bfloat16):
    """Fused TVAE forward. Returns (mu, logvar, z, xhat) like the nn.Module."""
    batch, input_dim = x.shape
    L = latent_dim
    assert input_dim <= H and L <= H

    def pad_w(w):                       # -> [H, H], zero-padded, matmul dtype
        r, c = w.shape
        return jnp.pad(w, ((0, H - r), (0, H - c))).astype(matmul_dtype)

    def pad_b(bvec):                    # -> [1, H] f32, zero-padded
        bvec = jnp.asarray(bvec, jnp.float32).reshape(1, -1)
        return jnp.pad(bvec, ((0, 0), (0, H - bvec.shape[1])))

    # Fused encoder head: mu columns at lanes [0, L), logvar at [H, H+L).
    ew3 = jnp.asarray(params["ew3"], jnp.float32)       # [hidden, 2L]
    eb3 = jnp.asarray(params["eb3"], jnp.float32).reshape(-1)   # [2L]
    r3 = ew3.shape[0]
    ew3_fused = jnp.zeros((H, 2 * H), jnp.float32)
    ew3_fused = ew3_fused.at[:r3, :L].set(ew3[:, :L])
    ew3_fused = ew3_fused.at[:r3, H:H + L].set(ew3[:, L:])
    ew3_fused = ew3_fused.astype(matmul_dtype)

    weights = (pad_w(params["ew1"]), pad_w(params["ew2"]), ew3_fused,
               pad_w(params["dw1"]), pad_w(params["dw2"]), pad_w(params["dw3"]))
    biases = jnp.concatenate(
        [pad_b(params["eb1"]), pad_b(params["eb2"]),
         pad_b(eb3[:L]), pad_b(eb3[L:]),
         pad_b(params["db1"]), pad_b(params["db2"]), pad_b(params["db3"]),
         jnp.zeros((1, H), jnp.float32)], axis=0)          # [8, 128]

    # Batch tiling: multiples of 16 (bf16 sublane packing); pad rows with
    # zeros (sliced away below).
    tb = max(16, min(tile_b, _round_up(batch, 16)))
    if _round_up(batch, tb) // tb < 2 and batch > 16:
        # keep >= 2 grid steps so v7x's two TensorCores both get work.
        tb = max(16, _round_up((batch + 1) // 2, 16))
    batch_p = _round_up(batch, tb)
    grid = (batch_p // tb,)

    x_p = jnp.zeros((batch_p, H), matmul_dtype)
    x_p = x_p.at[:batch, :input_dim].set(x.astype(matmul_dtype))
    eps_p = jnp.zeros((batch_p, H), jnp.bfloat16)
    eps_p = eps_p.at[:batch, :L].set(eps.astype(jnp.bfloat16))

    def row_spec(cols):                 # batch-tiled operand / output
        return pl.BlockSpec((tb, cols), lambda i: (i, 0))

    def res_spec(shape):                # resident across the whole grid
        return pl.BlockSpec(shape, lambda i: (0, 0))

    out = pl.pallas_call(
        functools.partial(tvae_kernel, matmul_dtype=matmul_dtype),
        out_shape=jax.ShapeDtypeStruct((batch_p, 4 * H), out_dtype),
        grid_spec=pltpu.PrefetchScalarGridSpec(
            num_scalar_prefetch=0,
            grid=grid,
            in_specs=[row_spec(H), row_spec(H)]                  # x, eps
                     + [res_spec((H, H)), res_spec((H, H)),      # ew1, ew2
                        res_spec((H, 2 * H)),                    # fused head
                        res_spec((H, H)), res_spec((H, H)),      # dw1, dw2
                        res_spec((H, H))]                        # dw3
                     + [res_spec((8, H))],                       # biases
            out_specs=row_spec(4 * H)),
        compiler_params=pltpu.CompilerParams(
            dimension_semantics=("parallel",)),          # v7x: 2 TCs share it
    )(x_p, eps_p, *weights, biases)

    mu = out[:batch, 0 * H:0 * H + L].astype(jnp.float32)
    logvar = out[:batch, 1 * H:1 * H + L].astype(jnp.float32)
    z = out[:batch, 2 * H:2 * H + L].astype(jnp.float32)
    xhat = out[:batch, 3 * H:3 * H + input_dim].astype(jnp.float32)
    return mu, logvar, z, xhat


def init_params(key, input_dim, latent_dim, hidden=H):
    """Deterministic synthetic parameters. Weights are [in, out] (W^T)."""
    ks = jax.random.split(key, 12)

    def lin(kw, kb, fan_in, fan_out):
        bound = 1.0 / jnp.sqrt(fan_in)
        w = jax.random.uniform(kw, (fan_in, fan_out), jnp.float32, -bound, bound)
        b = jax.random.uniform(kb, (1, fan_out), jnp.float32, -bound, bound)
        return w, b

    p = {}
    p["ew1"], p["eb1"] = lin(ks[0], ks[1], input_dim, hidden)
    p["ew2"], p["eb2"] = lin(ks[2], ks[3], hidden, hidden)
    p["ew3"], p["eb3"] = lin(ks[4], ks[5], hidden, latent_dim * 2)
    p["dw1"], p["db1"] = lin(ks[6], ks[7], latent_dim, hidden)
    p["dw2"], p["db2"] = lin(ks[8], ks[9], hidden, hidden)
    p["dw3"], p["db3"] = lin(ks[10], ks[11], hidden, input_dim)
    return p


def reference_forward(x, eps, params, *, latent_dim,
                      matmul_dtype=jnp.bfloat16):
    """Plain-JAX reference with the same matmul numerics as the kernel.

    `eps` should already carry the same rounding as the kernel input (bf16)."""
    L = latent_dim

    def mm(a, w):
        return jnp.dot(a.astype(matmul_dtype), w.astype(matmul_dtype),
                       preferred_element_type=jnp.float32)

    h = jnp.maximum(mm(x, params["ew1"]) + params["eb1"], 0.0)
    h = jnp.maximum(mm(h, params["ew2"]) + params["eb2"], 0.0)
    dist = mm(h, params["ew3"]) + params["eb3"]
    mu, logvar = dist[:, :L], dist[:, L:]
    z = mu + jnp.exp(0.5 * logvar) * eps
    g = jnp.maximum(mm(z, params["dw1"]) + params["db1"], 0.0)
    g = jnp.maximum(mm(g, params["dw2"]) + params["db2"], 0.0)
    xhat = mm(g, params["dw3"]) + params["db3"]
    return mu, logvar, z, xhat


if __name__ == "__main__":
    # Tabular (Personal_Loan-style) shapes; batch large enough to exercise
    # batch tiling (grid=(2,)) and non-multiple-of-tile padding.
    batch, input_dim, latent_dim = 500, 16, 8

    key = jax.random.PRNGKey(0)
    k_x, k_eps, k_params = jax.random.split(key, 3)

    x = jax.random.normal(k_x, (batch, input_dim), jnp.float32)
    eps = jax.random.normal(k_eps, (batch, latent_dim), jnp.float32)
    params = init_params(k_params, input_dim, latent_dim)

    mu, logvar, z, xhat = jax.block_until_ready(
        tvae_forward(x, eps, params, latent_dim=latent_dim))

    # the kernel consumes eps rounded to bf16; feed the reference the same.
    eps_rounded = eps.astype(jnp.bfloat16).astype(jnp.float32)
    mu_r, logvar_r, z_r, xhat_r = reference_forward(
        x, eps_rounded, params, latent_dim=latent_dim)

    assert mu.shape == (batch, latent_dim)
    assert logvar.shape == (batch, latent_dim)
    assert z.shape == (batch, latent_dim)
    assert xhat.shape == (batch, input_dim)

    for name, got, ref in (("mu", mu, mu_r), ("logvar", logvar, logvar_r),
                           ("z", z, z_r), ("xhat", xhat, xhat_r)):
        assert jnp.allclose(got, ref, atol=2e-2, rtol=2e-2), (
            name, float(jnp.max(jnp.abs(got - ref))))

    print("KERNEL_OK")
</pallas_src>

<mosaic_0001>
module attributes {stable_mosaic.version = 11 : i64} {
  func.func @tvae_kernel(%arg0: i32, %arg1: memref<256x128xbf16, #tpu.memory_space<vmem>>, %arg2: memref<256x128xbf16, #tpu.memory_space<vmem>>, %arg3: memref<128x128xbf16, #tpu.memory_space<vmem>>, %arg4: memref<128x128xbf16, #tpu.memory_space<vmem>>, %arg5: memref<128x256xbf16, #tpu.memory_space<vmem>>, %arg6: memref<128x128xbf16, #tpu.memory_space<vmem>>, %arg7: memref<128x128xbf16, #tpu.memory_space<vmem>>, %arg8: memref<128x128xbf16, #tpu.memory_space<vmem>>, %arg9: memref<8x128xf32, #tpu.memory_space<vmem>>, %arg10: memref<256x512xbf16, #tpu.memory_space<vmem>>) attributes {dimension_semantics = [#tpu.dimension_semantics<parallel>], iteration_bounds = array<i64: 2>, scalar_prefetch = 0 : i64, scratch_operands = 0 : i64, tpu.core_type = #tpu.core_type<tc>, window_params = [{transform_indices = @transform_0, window_bounds = array<i64: 256, 128>}, {transform_indices = @transform_1, window_bounds = array<i64: 256, 128>}, {pipeline_mode = #tpu.pipeline_mode<synchronous>, transform_indices = @transform_2, window_bounds = array<i64: 128, 128>}, {pipeline_mode = #tpu.pipeline_mode<synchronous>, transform_indices = @transform_3, window_bounds = array<i64: 128, 128>}, {pipeline_mode = #tpu.pipeline_mode<synchronous>, transform_indices = @transform_4, window_bounds = array<i64: 128, 256>}, {pipeline_mode = #tpu.pipeline_mode<synchronous>, transform_indices = @transform_5, window_bounds = array<i64: 128, 128>}, {pipeline_mode = #tpu.pipeline_mode<synchronous>, transform_indices = @transform_6, window_bounds = array<i64: 128, 128>}, {pipeline_mode = #tpu.pipeline_mode<synchronous>, transform_indices = @transform_7, window_bounds = array<i64: 128, 128>}, {pipeline_mode = #tpu.pipeline_mode<synchronous>, transform_indices = @transform_8, window_bounds = array<i64: 8, 128>}, {transform_indices = @transform_9, window_bounds = array<i64: 256, 512>}]} {
    %c0 = arith.constant 0 : index
    %c0_0 = arith.constant 0 : index
    %0 = vector.load %arg9[%c0, %c0_0] : memref<8x128xf32, #tpu.memory_space<vmem>>, vector<8x128xf32>
    %1 = vector.extract_strided_slice %0 {offsets = [0, 0], sizes = [1, 128], strides = [1, 1]} : vector<8x128xf32> to vector<1x128xf32>
    %2 = vector.extract_strided_slice %0 {offsets = [1, 0], sizes = [1, 128], strides = [1, 1]} : vector<8x128xf32> to vector<1x128xf32>
    %3 = vector.extract_strided_slice %0 {offsets = [2, 0], sizes = [1, 128], strides = [1, 1]} : vector<8x128xf32> to vector<1x128xf32>
    %4 = vector.extract_strided_slice %0 {offsets = [3, 0], sizes = [1, 128], strides = [1, 1]} : vector<8x128xf32> to vector<1x128xf32>
    %5 = vector.extract_strided_slice %0 {offsets = [4, 0], sizes = [1, 128], strides = [1, 1]} : vector<8x128xf32> to vector<1x128xf32>
    %6 = vector.extract_strided_slice %0 {offsets = [5, 0], sizes = [1, 128], strides = [1, 1]} : vector<8x128xf32> to vector<1x128xf32>
    %7 = vector.extract_strided_slice %0 {offsets = [6, 0], sizes = [1, 128], strides = [1, 1]} : vector<8x128xf32> to vector<1x128xf32>
    %c0_1 = arith.constant 0 : index
    %c0_2 = arith.constant 0 : index
    %8 = vector.load %arg1[%c0_1, %c0_2] : memref<256x128xbf16, #tpu.memory_space<vmem>>, vector<256x128xbf16>
    %c0_3 = arith.constant 0 : index
    %c0_4 = arith.constant 0 : index
    %9 = vector.load %arg3[%c0_3, %c0_4] : memref<128x128xbf16, #tpu.memory_space<vmem>>, vector<128x128xbf16>
    %cst = arith.constant dense<0.000000e+00> : vector<256x128xf32>
    %10 = tpu.matmul %8, %9, %cst {dimension_numbers = #tpu.dot_dimension_numbers<[1], [0], [0], [1], [0, 0, 1, 1], [], []>} : vector<256x128xbf16>, vector<128x128xbf16>, vector<256x128xf32> -> vector<256x128xf32>
    %11 = vector.broadcast %1 : vector<1x128xf32> to vector<256x128xf32>
    %12 = arith.addf %10, %11 : vector<256x128xf32>
    %cst_5 = arith.constant 0.000000e+00 : f32
    %13 = vector.broadcast %cst_5 : f32 to vector<256x128xf32>
    %14 = arith.maximumf %12, %13 : vector<256x128xf32>
    %15 = arith.truncf %14 : vector<256x128xf32> to vector<256x128xbf16>
    %c0_6 = arith.constant 0 : index
    %c0_7 = arith.constant 0 : index
    %16 = vector.load %arg4[%c0_6, %c0_7] : memref<128x128xbf16, #tpu.memory_space<vmem>>, vector<128x128xbf16>
    %cst_8 = arith.constant dense<0.000000e+00> : vector<256x128xf32>
    %17 = tpu.matmul %15, %16, %cst_8 {dimension_numbers = #tpu.dot_dimension_numbers<[1], [0], [0], [1], [0, 0, 1, 1], [], []>} : vector<256x128xbf16>, vector<128x128xbf16>, vector<256x128xf32> -> vector<256x128xf32>
    %18 = vector.broadcast %2 : vector<1x128xf32> to vector<256x128xf32>
    %19 = arith.addf %17, %18 : vector<256x128xf32>
    %cst_9 = arith.constant 0.000000e+00 : f32
    %20 = vector.broadcast %cst_9 : f32 to vector<256x128xf32>
    %21 = arith.maximumf %19, %20 : vector<256x128xf32>
    %22 = arith.truncf %21 : vector<256x128xf32> to vector<256x128xbf16>
    %c0_10 = arith.constant 0 : index
    %c0_11 = arith.constant 0 : index
    %23 = vector.load %arg5[%c0_10, %c0_11] : memref<128x256xbf16, #tpu.memory_space<vmem>>, vector<128x256xbf16>
    %cst_12 = arith.constant dense<0.000000e+00> : vector<256x256xf32>
    %24 = tpu.matmul %22, %23, %cst_12 {dimension_numbers = #tpu.dot_dimension_numbers<[1], [0], [0], [1], [0, 0, 1, 1], [], []>} : vector<256x128xbf16>, vector<128x256xbf16>, vector<256x256xf32> -> vector<256x256xf32>
    %25 = vector.extract_strided_slice %24 {offsets = [0, 0], sizes = [256, 128], strides = [1, 1]} : vector<256x256xf32> to vector<256x128xf32>
    %26 = vector.broadcast %3 : vector<1x128xf32> to vector<256x128xf32>
    %27 = arith.addf %25, %26 : vector<256x128xf32>
    %28 = vector.extract_strided_slice %24 {offsets = [0, 128], sizes = [256, 128], strides = [1, 1]} : vector<256x256xf32> to vector<256x128xf32>
    %29 = vector.broadcast %4 : vector<1x128xf32> to vector<256x128xf32>
    %30 = arith.addf %28, %29 : vector<256x128xf32>
    %cst_13 = arith.constant 5.000000e-01 : f32
    %31 = vector.broadcast %cst_13 : f32 to vector<256x128xf32>
    %32 = arith.mulf %31, %30 : vector<256x128xf32>
    %33 = math.exp %32 : vector<256x128xf32>
    %c0_14 = arith.constant 0 : index
    %c0_15 = arith.constant 0 : index
    %34 = vector.load %arg2[%c0_14, %c0_15] : memref<256x128xbf16, #tpu.memory_space<vmem>>, vector<256x128xbf16>
    %35 = arith.extf %34 : vector<256x128xbf16> to vector<256x128xf32>
    %36 = arith.mulf %33, %35 : vector<256x128xf32>
    %37 = arith.addf %27, %36 : vector<256x128xf32>
    %38 = arith.truncf %37 : vector<256x128xf32> to vector<256x128xbf16>
    %c0_16 = arith.constant 0 : index
    %c0_17 = arith.constant 0 : index
    %39 = vector.load %arg6[%c0_16, %c0_17] : memref<128x128xbf16, #tpu.memory_space<vmem>>, vector<128x128xbf16>
    %cst_18 = arith.constant dense<0.000000e+00> : vector<256x128xf32>
    %40 = tpu.matmul %38, %39, %cst_18 {dimension_numbers = #tpu.dot_dimension_numbers<[1], [0], [0], [1], [0, 0, 1, 1], [], []>} : vector<256x128xbf16>, vector<128x128xbf16>, vector<256x128xf32> -> vector<256x128xf32>
    %41 = vector.broadcast %5 : vector<1x128xf32> to vector<256x128xf32>
    %42 = arith.addf %40, %41 : vector<256x128xf32>
    %cst_19 = arith.constant 0.000000e+00 : f32
    %43 = vector.broadcast %cst_19 : f32 to vector<256x128xf32>
    %44 = arith.maximumf %42, %43 : vector<256x128xf32>
    %45 = arith.truncf %44 : vector<256x128xf32> to vector<256x128xbf16>
    %c0_20 = arith.constant 0 : index
    %c0_21 = arith.constant 0 : index
    %46 = vector.load %arg7[%c0_20, %c0_21] : memref<128x128xbf16, #tpu.memory_space<vmem>>, vector<128x128xbf16>
    %cst_22 = arith.constant dense<0.000000e+00> : vector<256x128xf32>
    %47 = tpu.matmul %45, %46, %cst_22 {dimension_numbers = #tpu.dot_dimension_numbers<[1], [0], [0], [1], [0, 0, 1, 1], [], []>} : vector<256x128xbf16>, vector<128x128xbf16>, vector<256x128xf32> -> vector<256x128xf32>
    %48 = vector.broadcast %6 : vector<1x128xf32> to vector<256x128xf32>
    %49 = arith.addf %47, %48 : vector<256x128xf32>
    %cst_23 = arith.constant 0.000000e+00 : f32
    %50 = vector.broadcast %cst_23 : f32 to vector<256x128xf32>
    %51 = arith.maximumf %49, %50 : vector<256x128xf32>
    %52 = arith.truncf %51 : vector<256x128xf32> to vector<256x128xbf16>
    %c0_24 = arith.constant 0 : index
    %c0_25 = arith.constant 0 : index
    %53 = vector.load %arg8[%c0_24, %c0_25] : memref<128x128xbf16, #tpu.memory_space<vmem>>, vector<128x128xbf16>
    %cst_26 = arith.constant dense<0.000000e+00> : vector<256x128xf32>
    %54 = tpu.matmul %52, %53, %cst_26 {dimension_numbers = #tpu.dot_dimension_numbers<[1], [0], [0], [1], [0, 0, 1, 1], [], []>} : vector<256x128xbf16>, vector<128x128xbf16>, vector<256x128xf32> -> vector<256x128xf32>
    %55 = vector.broadcast %7 : vector<1x128xf32> to vector<256x128xf32>
    %56 = arith.addf %54, %55 : vector<256x128xf32>
    %57 = arith.truncf %27 : vector<256x128xf32> to vector<256x128xbf16>
    %c0_27 = arith.constant 0 : index
    %c0_28 = arith.constant 0 : index
    %58 = vector.load %arg10[%c0_27, %c0_28] : memref<256x512xbf16, #tpu.memory_space<vmem>>, vector<256x128xbf16>
    tpu.vector_store %arg10[%c0_27, %c0_28], %57 {strides = array<i32>} : memref<256x512xbf16, #tpu.memory_space<vmem>>, vector<256x128xbf16>,
    %59 = arith.truncf %30 : vector<256x128xf32> to vector<256x128xbf16>
    %c0_29 = arith.constant 0 : index
    %c128 = arith.constant 128 : index
    %60 = vector.load %arg10[%c0_29, %c128] : memref<256x512xbf16, #tpu.memory_space<vmem>>, vector<256x128xbf16>
    tpu.vector_store %arg10[%c0_29, %c128], %59 {strides = array<i32>} : memref<256x512xbf16, #tpu.memory_space<vmem>>, vector<256x128xbf16>,
    %61 = arith.truncf %37 : vector<256x128xf32> to vector<256x128xbf16>
    %c0_30 = arith.constant 0 : index
    %c256 = arith.constant 256 : index
    %62 = vector.load %arg10[%c0_30, %c256] : memref<256x512xbf16, #tpu.memory_space<vmem>>, vector<256x128xbf16>
    tpu.vector_store %arg10[%c0_30, %c256], %61 {strides = array<i32>} : memref<256x512xbf16, #tpu.memory_space<vmem>>, vector<256x128xbf16>,
    %63 = arith.truncf %56 : vector<256x128xf32> to vector<256x128xbf16>
    %c0_31 = arith.constant 0 : index
    %c384 = arith.constant 384 : index
    %64 = vector.load %arg10[%c0_31, %c384] : memref<256x512xbf16, #tpu.memory_space<vmem>>, vector<256x128xbf16>
    tpu.vector_store %arg10[%c0_31, %c384], %63 {strides = array<i32>} : memref<256x512xbf16, #tpu.memory_space<vmem>>, vector<256x128xbf16>,
    return
  }
  func.func @transform_0(%arg0: i32) -> (i32, i32) {
    %c0_i32 = arith.constant 0 : i32
    %c0_i32_0 = arith.constant 0 : i32
    return %arg0, %c0_i32 : i32, i32
  }
  func.func @transform_1(%arg0: i32) -> (i32, i32) {
    %c0_i32 = arith.constant 0 : i32
    %c0_i32_0 = arith.constant 0 : i32
    return %arg0, %c0_i32 : i32, i32
  }
  func.func @transform_2(%arg0: i32) -> (i32, i32) {
    %c0_i32 = arith.constant 0 : i32
    %c0_i32_0 = arith.constant 0 : i32
    %c0_i32_1 = arith.constant 0 : i32
    return %c0_i32, %c0_i32_0 : i32, i32
  }
  func.func @transform_3(%arg0: i32) -> (i32, i32) {
    %c0_i32 = arith.constant 0 : i32
    %c0_i32_0 = arith.constant 0 : i32
    %c0_i32_1 = arith.constant 0 : i32
    return %c0_i32, %c0_i32_0 : i32, i32
  }
  func.func @transform_4(%arg0: i32) -> (i32, i32) {
    %c0_i32 = arith.constant 0 : i32
    %c0_i32_0 = arith.constant 0 : i32
    %c0_i32_1 = arith.constant 0 : i32
    return %c0_i32, %c0_i32_0 : i32, i32
  }
  func.func @transform_5(%arg0: i32) -> (i32, i32) {
    %c0_i32 = arith.constant 0 : i32
    %c0_i32_0 = arith.constant 0 : i32
    %c0_i32_1 = arith.constant 0 : i32
    return %c0_i32, %c0_i32_0 : i32, i32
  }
  func.func @transform_6(%arg0: i32) -> (i32, i32) {
    %c0_i32 = arith.constant 0 : i32
    %c0_i32_0 = arith.constant 0 : i32
    %c0_i32_1 = arith.constant 0 : i32
    return %c0_i32, %c0_i32_0 : i32, i32
  }
  func.func @transform_7(%arg0: i32) -> (i32, i32) {
    %c0_i32 = arith.constant 0 : i32
    %c0_i32_0 = arith.constant 0 : i32
    %c0_i32_1 = arith.constant 0 : i32
    return %c0_i32, %c0_i32_0 : i32, i32
  }
  func.func @transform_8(%arg0: i32) -> (i32, i32) {
    %c0_i32 = arith.constant 0 : i32
    %c0_i32_0 = arith.constant 0 : i32
    %c0_i32_1 = arith.constant 0 : i32
    return %c0_i32, %c0_i32_0 : i32, i32
  }
  func.func @transform_9(%arg0: i32) -> (i32, i32) {
    %c0_i32 = arith.constant 0 : i32
    %c0_i32_0 = arith.constant 0 : i32
    return %arg0, %c0_i32 : i32, i32
  }
}

</mosaic_0001>

<bundles_post_ra>
// kernel: tpu_custom_call.1
= control target key start
LH: loop header
LB: loop body
LE: loop exit
PB: predicated region body
PF: predicated region fallthrough
CT: control target
= control target key end

     0   :  { %s5728_s0 = inlined_call_operand.hbm [shape: bf16[512,128], index: 0, kind: input, shape index: {}]   ;;  %s5729_s1 = inlined_call_operand.hbm [shape: bf16[512,128], index: 1, kind: input, shape index: {}]   ;;  %s5730_s2 = inlined_call_operand.hbm [shape: bf16[128,128], index: 2, kind: input, shape index: {}]   ;;  %s5731_s3 = inlined_call_operand.hbm [shape: bf16[128,128], index: 3, kind: input, shape index: {}]   ;;  %s5732_s4 = inlined_call_operand.hbm [shape: bf16[128,256], index: 4, kind: input, shape index: {}]   ;;  %s5733_s5 = inlined_call_operand.hbm [shape: bf16[128,128], index: 5, kind: input, shape index: {}]   ;;  %s5734_s6 = inlined_call_operand.hbm [shape: bf16[128,128], index: 6, kind: input, shape index: {}]   ;;  %s5735_s7 = inlined_call_operand.hbm [shape: bf16[128,128], index: 7, kind: input, shape index: {}]   ;;  %s5736_s8 = inlined_call_operand.vmem [shape: f32[8,128], index: 8, kind: input, shape index: {}]   ;;  %s5737_s9 = inlined_call_operand.hbm [shape: bf16[512,512], index: 9, kind: output, shape index: {}]  }
   0x1   :  { %5745 = sst [smem:[#allocation24_spill]] %s5728_s0 }
   0x2   :  { %5746 = sst [smem:[#allocation25_spill]] %s5730_s2 }
   0x3   :  { %5747 = sst [smem:[#allocation26_spill]] %s5731_s3 }
   0x4   :  { %5748 = sst [smem:[#allocation27_spill]] %s5732_s4 }
   0x5   :  { %5749 = sst [smem:[#allocation28_spill]] %s5733_s5 }
   0x6   :  { %5750 = sst [smem:[#allocation29_spill]] %s5734_s6 }
   0x7   :  { %14 = vsyncpa [#allocation3], 0 }
   0x8   :  { %16 = vsyncpa [#allocation3 + $0x1], 0 }
   0x9   :  { %17 = vsyncpa [#allocation6], 0 }
   0xa   :  { %19 = vsyncpa [#allocation6 + $0x1], 0 }
   0xb   :  { %20 = vsyncpa [#allocation9], 0 }
   0xc   :  { %21 = vsyncpa [#allocation12], 0 }
   0xd   :  { %22 = vsyncpa [#allocation15], 0 }
   0xe   :  { %23 = vsyncpa [#allocation4], 0 }
   0xf   :  { %25 = vsyncpa [#allocation4 + $0x1], 0  ;;  %s4787_s30 = smov 0   ;;  %s4789_s10 = smov 0  }
  0x10   :  { %s4791_s11 = smov 0   ;;  %s4793_s12 = smov 0  }
  0x11 LB: > { %s4721_s13 = smov [#allocation7]   ;;  %s4808_s15 = sadd.s32 4294967295, %s4719_s12   ;;  %s4719_s12 = sphi %s4793_s12, %s5782_s12   ;;  %s4715_s11 = sphi %s4791_s11, %s5781_s11   ;;  %s4711_s10 = sphi %s4789_s10, %s5780_s10   ;;  %s4707_s30 = sphi %s4787_s30, %s5779_s30  }
  0x12   : > { %s273_s14 = sshll.u32 %s4721_s13, 4  ;;  %p3342_p0 = scmp.ge.s32.totalorder %s4719_s12, 1  ;;  %s274_s14 = int_to_ptr.vmem [resolvable:$true] %s273_s14 }
  0x13   : > { %p5742_p1 = scmp.eq.s32.totalorder %s4808_s15, 0  ;;  %p261_p2 = scmp.lt.s32.totalorder %s4719_s12, 3 }
  0x14   : > { %s4722_s17 = smov [#allocation8]   ;;  %s4723_s20 = smov [#allocation11]  }
  0x15   : > { %p4813_p3 = pnand %p3342_p0, %p261_p2  ;;  %s286_s18 = sshll.u32 %s4722_s17, 4  ;;  %s4826_s18 = int_to_ptr.vmem [resolvable:$true] %s286_s18 }
  0x16   : > { %s312_s21 = sshll.u32 %s4723_s20, 4  ;;  %s4434_s23 = scalar_lea.vmem %s274_s14, 1024  ;;  %s4828_s21 = int_to_ptr.vmem [resolvable:$true] %s312_s21 }
  0x17   : > { %p4189_p5 = pneg %p4813_p3  ;;  %p4435_p8 = scmp.ne.s32.totalorder %s274_s14, %s4434_s23 }
  0x18   : > { %p4442_p11 = scmp.lt.s32.totalorder %s274_s14, %s274_s14  ;;  %p4443_p12 = scmp.lt.s32.totalorder %s4434_s23, %s4434_s23 }
  0x19   : > { %p4822_p6 = pnand %p4189_p5, %p5742_p1 }
  0x1a   : > { %p4444_p13 = por %p4443_p12, %p4442_p11 }
  0x1b   : > { %p4832_p7 = pneg %p4822_p6 }
  0x1d   : > { %p4437_p9 = pnand %p4435_p8, %p4832_p7 }
  0x1f   : > { %p4438_p10 = pneg %p4437_p9 }
  0x21   : > { %p4445_p0 = pnand %p4444_p13, %p4438_p10 }
  0x23   : > { %4448 = shalt.err (!%p4445_p0)
}
  0x24   : > { %s5738_s24 = smov 64   ;;  %s5740_s25 = smov 4  }
  0x25   : > { %s5754_s2 = sld [smem:[#allocation25_spill]]  ;;  %s4460_s28 = scalar_lea.vmem %s4826_s18, 1024 }
  0x26   : > { %p4461_p2 = scmp.ne.s32.totalorder %s4826_s18, %s4460_s28  ;;  %p4468_p9 = scmp.lt.s32.totalorder %s4826_s18, %s4826_s18 }
  0x27   : > { %p4469_p10 = scmp.lt.s32.totalorder %s4460_s28, %s4460_s28 }
  0x28   : > { %p4463_p5 = pnand %p4461_p2, %p4832_p7 }
  0x29   : > { %p4470_p11 = por %p4469_p10, %p4468_p9 }
  0x2a   : > { %p4464_p8 = pneg %p4463_p5 }
  0x2b   : > { %4192 = dma.hbm_to_vmem [thread:$0]  (!%p4822_p6), %s5754_s2, 1024, %s274_s14, [#allocation6], %s5738_s24, %s5738_s24, %s5740_s25  }
  0x2c   : > { %p4471_p12 = pnand %p4470_p11, %p4464_p8 }
  0x2e   : > { %4474 = shalt.err (!%p4471_p12)
}
  0x2f   : > { %s5755_s3 = sld [smem:[#allocation26_spill]]  ;;  %s4486_s14 = scalar_lea.vmem %s4828_s21, 1024 }
  0x30   : > { %p4487_p13 = scmp.ne.s32.totalorder %s4828_s21, %s4486_s14  ;;  %p4494_p5 = scmp.lt.s32.totalorder %s4828_s21, %s4828_s21 }
  0x31   : > { %p4495_p8 = scmp.lt.s32.totalorder %s4486_s14, %s4486_s14 }
  0x32   : > { %p4489_p0 = pnand %p4487_p13, %p4832_p7 }
  0x33   : > { %p4496_p9 = por %p4495_p8, %p4494_p5 }
  0x34   : > { %p4490_p2 = pneg %p4489_p0 }
  0x35   : > { %4195 = dma.hbm_to_vmem [thread:$0]  (!%p4822_p6), %s5755_s3, 1024, %s4826_s18, [#allocation9], %s5738_s24, %s5738_s24, %s5740_s25  }
  0x36   : > { %p4497_p10 = pnand %p4496_p9, %p4490_p2 }
  0x38   : > { %4500 = shalt.err (!%p4497_p10)
}
  0x39   : > { %s5756_s5 = sld [smem:[#allocation28_spill]]  ;;  %s4726_s18 = smov [#allocation10]  }
  0x3a   : > { %s299_s23 = sshll.u32 %s4726_s18, 4  ;;  %s300_s23 = int_to_ptr.vmem [resolvable:$true] %s299_s23 }
  0x3b   : > { %s4512_s26 = scalar_lea.vmem %s300_s23, 2048  ;;  %p4520_p0 = scmp.lt.s32.totalorder %s300_s23, %s300_s23 }
  0x3c   : > { %p4513_p11 = scmp.ne.s32.totalorder %s300_s23, %s4512_s26  ;;  %p4521_p2 = scmp.lt.s32.totalorder %s4512_s26, %s4512_s26 }
  0x3e   : > { %p4515_p12 = pnand %p4513_p11, %p4832_p7  ;;  %p4522_p5 = por %p4521_p2, %p4520_p0 }
  0x3f   : > { %4201 = dma.hbm_to_vmem [thread:$0]  (!%p4822_p6), %s5756_s5, 1024, %s4828_s21, [#allocation12], %s5738_s24, %s5738_s24, %s5740_s25  }
  0x40   : > { %p4516_p13 = pneg %p4515_p12 }
  0x42   : > { %p4523_p8 = pnand %p4522_p5, %p4516_p13 }
  0x44   : > { %4526 = shalt.err (!%p4523_p8)
}
  0x45   : > { %s4727_s27 = smov 128   ;;  %s4728_s28 = smov 8  }
  0x46   : > { %s5757_s4 = sld [smem:[#allocation27_spill]]  ;;  %s4729_s13 = smov [#allocation13]  }
  0x47   : > { %s325_s14 = sshll.u32 %s4729_s13, 4  ;;  %s4730_s17 = smov [#allocation14]   ;;  %s326_s14 = int_to_ptr.vmem [resolvable:$true] %s325_s14 }
  0x48   : > { %s338_s20 = sshll.u32 %s4730_s17, 4  ;;  %s4538_s18 = scalar_lea.vmem %s326_s14, 1024  ;;  %s339_s20 = int_to_ptr.vmem [resolvable:$true] %s338_s20 }
  0x49   : > { %p4539_p9 = scmp.ne.s32.totalorder %s326_s14, %s4538_s18  ;;  %p4546_p12 = scmp.lt.s32.totalorder %s326_s14, %s326_s14 }
  0x4a   : > { %p4547_p13 = scmp.lt.s32.totalorder %s4538_s18, %s4538_s18 }
  0x4b   : > { %p4541_p10 = pnand %p4539_p9, %p4832_p7 }
  0x4c   : > { %4198 = dma.hbm_to_vmem [thread:$0]  (!%p4822_p6), %s5757_s4, 2048, %s300_s23, [#allocation9], %s4727_s27, %s4727_s27, %s4728_s28  }
  0x4d   : > { %p4542_p11 = pneg %p4541_p10  ;;  %p4548_p0 = por %p4547_p13, %p4546_p12 }
  0x4f   : > { %p4549_p2 = pnand %p4548_p0, %p4542_p11 }
  0x51   : > { %4552 = shalt.err (!%p4549_p2)
}
  0x52   : > { %s5758_s6 = sld [smem:[#allocation29_spill]]  ;;  %s4564_s27 = scalar_lea.vmem %s339_s20, 1024 }
  0x53   : > { %p4565_p5 = scmp.ne.s32.totalorder %s339_s20, %s4564_s27  ;;  %p4572_p10 = scmp.lt.s32.totalorder %s339_s20, %s339_s20 }
  0x54   : > { %p4573_p4 = scmp.lt.s32.totalorder %s4564_s27, %s4564_s27 }
  0x55   : > { %p4567_p8 = pnand %p4565_p5, %p4832_p7 }
  0x56   : > { %p4574_p12 = por %p4573_p4, %p4572_p10 }
  0x57   : > { %p4568_p9 = pneg %p4567_p8 }
  0x58   : > { %4204 = dma.hbm_to_vmem [thread:$0]  (!%p4822_p6), %s5758_s6, 1024, %s326_s14, [#allocation12], %s5738_s24, %s5738_s24, %s5740_s25  }
  0x59   : > { %p4575_p11 = pnand %p4574_p12, %p4568_p9 }
  0x5b   : > { %4578 = shalt.err (!%p4575_p11)
}
  0x5c   : > { %4207 = dma.hbm_to_vmem [thread:$0]  (!%p4822_p6), %s5735_s7, 1024, %s339_s20, [#allocation15], %s5738_s24, %s5738_s24, %s5740_s25  }
  0x5d   : > { %s3341_s19 = sadd.s32 4294967294, %s4719_s12   ;;  %s4905_s22 = sadd.s32 1, %s4719_s12  }
  0x5e   : > { %s35_s21 = ssub.s32 %s4719_s12, %s4905_s22  ;;  %s38_s13 = sadd.s32 1, %s4715_s11 }
  0x5f   : > { %p36_p4 = scmp.eq.s32.totalorder %s35_s21, 0  ;;  %p45_p7 = scmp.ne.s32.totalorder %s4715_s11, %s4711_s10 }
  0x60   : > { %p46_p13 = scmp.eq.s32.totalorder %s4719_s12, 0  ;;  %p51_p0 = scmp.ne.s32.totalorder %s4711_s10, %s4707_s30 }
  0x61   : > { %s4916_s14 = scalar_select %p36_p4, %s4715_s11, %s38_s13  }
  0x62   : > { %p4918_p2 = por %p46_p13, %p45_p7  ;;  %p4924_p6 = por %p5742_p1, %p51_p0 }
  0x63   : > { %p248_p5 = scmp.eq.s32.totalorder %s4808_s15, 1  ;;  %p254_p8 = scmp.eq.s32.totalorder %s3341_s19, 1 }
  0x64   : > { %s5760_s20 = scalar_select %p4924_p6, 1, 0 }
  0x65   : > { %p4225_p9 = scmp.lt.s32.totalorder %s4719_s12, 2  ;;  %s355_s18 = sand.u32 1, %s4715_s11  }
  0x66   : > { %p4931_p10 = por %p248_p5, %p45_p7  ;;  %p4935_p12 = por %p254_p8, %p51_p0 }
  0x67   : > { %s3350_s27 = sshll.u32 %s355_s18, 7  ;;  %s3572_s28 = sshll.u32 %s4719_s12, 11 }
  0x68   : > { %s5761_s23 = scalar_select %p4931_p10, 1, 0 }
  0x69   : > { %s5762_s26 = scalar_select %p4935_p12, 1, 0 }
  0x6a   : > { %s5763_s0 = sld [smem:[#allocation24_spill]]  ;;  %s359_s19 = scalar_lea.vmem [#allocation2], %s3350_s27 }
  0x6b   : > { %s366_s24 = sshll.u32 %s359_s19, 4  ;;  %p4949_p11 = pnand %p4225_p9, %p4918_p2  ;;  %s4945_s24 = int_to_ptr.vmem [resolvable:$true] %s366_s24 }
  0x6c   : > { %s4956_s29 = scalar_lea.hbm %s5729_s1, %s3572_s28  ;;  %s380_s21 = scalar_lea.vmem [#allocation5], %s3350_s27 }
  0x6d   : > { %s4958_s4 = sshll.u32 %s380_s21, 4  ;;  %s4960_s5 = scalar_lea.sflag [#allocation3], %s355_s18  ;;  %s4991_s4 = int_to_ptr.vmem [resolvable:$true] %s4958_s4 }
  0x6e   : > { %p4581_p7 = pneg %p4949_p11 }
  0x70   : > { %s4943_s13 = scalar_lea.hbm %s5763_s0, %s3572_s28  ;;  %s4584_s2 = scalar_lea.hbm %s5763_s0, 4096 }
  0x71   : > { %s4579_s19 = scalar_lea.hbm %s4943_s13, 2048  ;;  %p4585_p2 = scmp.lt.s32.totalorder %s4943_s13, %s5763_s0 }
  0x72   : > { %p4580_p4 = scmp.ne.s32.totalorder %s4943_s13, %s4579_s19  ;;  %p4586_p5 = scmp.lt.s32.totalorder %s4584_s2, %s4579_s19 }
  0x74   : > { %p4582_p13 = pnand %p4581_p7, %p4580_p4  ;;  %p4587_p8 = por %p4586_p5, %p4585_p2 }
  0x76   : > { %p4583_p0 = pneg %p4582_p13 }
  0x78   : > { %p4588_p9 = pnand %p4587_p8, %p4583_p0 }
  0x7a   : > { %4591 = shalt.err (!%p4588_p9)
}
  0x7b   : > { %s4592_s18 = scalar_lea.vmem %s4945_s24, 2048  ;;  %s4731_s6 = smov [#allocation2]  }
  0x7c   : > { %p4593_p1 = scmp.ne.s32.totalorder %s4945_s24, %s4592_s18  ;;  %s4597_s27 = sshll.u32 %s4731_s6, 4  ;;  %s4598_s27 = int_to_ptr.vmem [resolvable:$false] %s4597_s27 }
  0x7d   : > { %s4599_s21 = scalar_lea.vmem %s4598_s27, 4096  ;;  %p4600_p12 = scmp.lt.s32.totalorder %s4945_s24, %s4598_s27 }
  0x7e   : > { %p4595_p4 = pnand %p4593_p1, %p4581_p7  ;;  %p4601_p10 = scmp.lt.s32.totalorder %s4599_s21, %s4592_s18 }
  0x80   : > { %p4596_p13 = pneg %p4595_p4  ;;  %p4602_p6 = por %p4601_p10, %p4600_p12 }
  0x82   : > { %p4603_p2 = pnand %p4602_p6, %p4596_p13 }
  0x84   : > { %4606 = shalt.err (!%p4603_p2)
}
  0x85   : > { %s5765_s19 = smov 4   ;;  %s5766_s17 = smov 64  }
  0x86   : > { %4211 = dma.hbm_to_vmem [thread:$0]  (!%p4949_p11), %s4943_s13, 2048, %s4945_s24, %s4960_s5, %s5766_s17, %s5766_s17, %s5765_s19  }
  0x87   : > { %s376_s2 = sand.u32 1, %s4719_s12   ;;  %s4607_s28 = scalar_lea.hbm %s4956_s29, 2048 }
  0x88   : > { %s377_s3 = scalar_lea.sflag [#allocation6], %s376_s2  ;;  %p4608_p1 = scmp.ne.s32.totalorder %s4956_s29, %s4607_s28 }
  0x89   : > { %s4612_s27 = scalar_lea.hbm %s5729_s1, 4096  ;;  %p4613_p12 = scmp.lt.s32.totalorder %s4956_s29, %s5729_s1 }
  0x8a   : > { %p4610_p6 = pnand %p4608_p1, %p4581_p7  ;;  %p4614_p0 = scmp.lt.s32.totalorder %s4612_s27, %s4607_s28 }
  0x8c   : > { %p4611_p10 = pneg %p4610_p6  ;;  %p4615_p5 = por %p4614_p0, %p4613_p12 }
  0x8e   : > { %p4616_p8 = pnand %p4615_p5, %p4611_p10 }
  0x90   : > { %4619 = shalt.err (!%p4616_p8)
}
  0x91   : > { %s4620_s5 = scalar_lea.vmem %s4991_s4, 2048  ;;  %s4732_s24 = smov [#allocation5]  }
  0x92   : > { %p4621_p9 = scmp.ne.s32.totalorder %s4991_s4, %s4620_s5  ;;  %s4625_s13 = sshll.u32 %s4732_s24, 4  ;;  %s4626_s13 = int_to_ptr.vmem [resolvable:$false] %s4625_s13 }
  0x93   : > { %s4627_s2 = scalar_lea.vmem %s4626_s13, 4096  ;;  %p4628_p2 = scmp.lt.s32.totalorder %s4991_s4, %s4626_s13 }
  0x94   : > { %p4623_p4 = pnand %p4621_p9, %p4581_p7  ;;  %p4629_p1 = scmp.lt.s32.totalorder %s4627_s2, %s4620_s5 }
  0x96   : > { %p4624_p13 = pneg %p4623_p4  ;;  %p4630_p6 = por %p4629_p1, %p4628_p2 }
  0x98   : > { %p4631_p12 = pnand %p4630_p6, %p4624_p13 }
  0x9a   : > { %4634 = shalt.err (!%p4631_p12)
}
  0x9b   : > { %4214 = dma.hbm_to_vmem [thread:$0]  (!%p4949_p11), %s4956_s29, 2048, %s4991_s4, %s377_s3, %s5766_s17, %s5766_s17, %s5765_s19  }
  0x9c   : > { %399 = sbr.rel (%p4813_p3) target bundleno = 1596 (0x63c), region = 56  ;;  %s5022_s0 = sand.u32 (!%p4813_p3), 1, %s4711_s10  }
  0x9d   : > { %s3357_s28 = sshll.u32 (!%p4813_p3), %s5022_s0, 7  ;;  %s402_s18 = scalar_lea.sflag (!%p4813_p3), [#allocation3], %s5022_s0 }
  0x9e   : > { %s5026_s6 = scalar_lea.vmem (!%p4813_p3), [#allocation2], %s3357_s28  ;;  %p5767_p7 = scmp.ne.s32.totalorder (!%p4813_p3), %s5760_s20, 0 }
  0xa1   : > { %4678 = dma.done.wait (%p5767_p7), %s402_s18, 2048  }
  0xa2   : > { %4680 = vsyncadd (%p5767_p7), %s402_s18, 4294965248  ;;  %s410_s4 = sand.u32 1, %s4808_s15   ;;  %s5033_s25 = scalar_lea.vmem [#allocation5], %s3357_s28 }
  0xa3   : > { %s411_s16 = scalar_lea.sflag [#allocation6], %s410_s4 }
  0xa4   : > { %4682 = dma.done.wait (%p5767_p7), %s411_s16, 2048  }
  0xa5   : > { %4684 = vsyncadd (%p5767_p7), %s411_s16, 4294965248  ;;  %p5768_p3 = scmp.eq.s32.totalorder %s4808_s15, 0 }
  0xa7   : > { %4686 = dma.done.wait (%p5768_p3), [#allocation6], 1024   ;;  %p5769_p11 = pmov %p5768_p3 }
  0xa8   : > { %p5770_p10 = pmov %p5768_p3 }
  0xa9   : > { %4688 = vsyncadd (%p5769_p11), [#allocation6], 4294966272 }
  0xaa   : > { %4690 = dma.done.wait (%p5770_p10), [#allocation9], 3072   ;;  %p5771_p0 = pmov %p5768_p3 }
  0xac   : > { %4692 = vsyncadd (%p5771_p0), [#allocation9], 4294964224  ;;  %p5772_p5 = pmov %p5771_p0 }
  0xad   : > { %p5773_p8 = pmov %p5771_p0 }
  0xae   : > { %4694 = dma.done.wait (%p5772_p5), [#allocation12], 2048  }
  0xaf   : > { %4696 = vsyncadd (%p5773_p8), [#allocation12], 4294965248  ;;  %p5774_p9 = pmov %p5771_p0 }
  0xb0   : > { %p5775_p4 = pmov %p5771_p0 }
  0xb1   : > { %4698 = dma.done.wait (%p5774_p9), [#allocation15], 1024  }
  0xb2   : > { %4700 = vsyncadd (%p5775_p4), [#allocation15], 4294966272  ;;  %v4278_v0 = vld [vmem:[#allocation7 + $0x38] sm:$0xff]   ;;  %v4279_v1 = vld [vmem:[#allocation7 + $0x30] sm:$0xff]   ;;  %v531_v42 = vlaneseq  ;;  %s3365_s19 = sshll.u32 %s5022_s0, 9  ;;  %s3703_s21 = sshll.u32 %s4808_s15, 13 }
  0xb3   : > { %3903 = vmatprep.subr.bf16.mxu0 %v4278_v0  ;;  %4143 = vmatprep.subr.bf16.mxu1 %v4278_v0  ;;  %v4280_v2 = vld [vmem:[#allocation7 + $0x28] sm:$0xff]   ;;  %v4281_v3 = vld [vmem:[#allocation7 + $0x20] sm:$0xff]   ;;  %v4282_v5 = vld [vmem:[#allocation7 + $0x18] sm:$0xff]   ;;  %s5190_s17 = scalar_lea.vmem [#allocation16], %s3365_s19  ;;  %s5681_s2 = scalar_lea.hbm %s5737_s9, %s3703_s21 }
  0xb4   : > { %3904 = vmatpush3.bf16.msra.mxu0 %v4278_v0  ;;  %4151 = vmatpush3.bf16.msra.mxu1 %v4278_v0  ;;  %v4286_v4 = vld [vmem:[%s5026_s6] sm:$0xff]   ;;  %v4283_v6 = vld [vmem:[#allocation7 + $0x10] sm:$0xff]   ;;  %v4284_v8 = vld [vmem:[#allocation7 + $0x8] sm:$0xff]   ;;  %v5071_v43 = vshrl.u32 %v531_v42, 7  ;;  %s3188_s5 = sshll.u32 %s5190_s17, 4  ;;  %s3174_s15 = scalar_lea.sflag [#allocation4], %s5022_s0  ;;  %s5683_s5 = int_to_ptr.vmem [resolvable:$true] %s3188_s5 }
  0xb5   : > { %3905 = vmatprep.subr.bf16.mxu0 %v4279_v1  ;;  %4144 = vmatprep.subr.bf16.mxu1 %v4279_v1  ;;  %v4294_v7 = vld [vmem:[%s5026_s6 + $0x40] sm:$0xff]   ;;  %v4287_v10 = vld [vmem:[%s5026_s6 + $0x8] sm:$0xff]   ;;  %v4302_v12 = vld [vmem:[#allocation8 + $0x38] sm:$0xff]   ;;  %s4635_s28 = scalar_lea.vmem %s5683_s5, 8192  ;;  %p5776_p2 = scmp.ne.s32.totalorder %s5761_s23, 0 }
  0xb6   : > { %3919 = vmatprep.mubr.bf16.mxu0 %v4286_v4  ;;  %3935 = vmatprep.mubr.bf16.mxu1 %v4294_v7  ;;  %v4285_v9 = vld [vmem:[#allocation7] sm:$0xff]   ;;  %v4295_v11 = vld [vmem:[%s5026_s6 + $0x48] sm:$0xff]   ;;  %v4288_v13 = vld [vmem:[%s5026_s6 + $0x10] sm:$0xff]   ;;  %v533_v44 = vsub.s32 0, %v5071_v43  ;;  %p4636_p13 = scmp.ne.s32.totalorder %s5683_s5, %s4635_s28  ;;  %s4734_s18 = smov [#allocation16]  }
  0xb7   : > { %v4296_v14 = vld [vmem:[%s5026_s6 + $0x50] sm:$0xff]   ;;  %v4304_v16 = vld [vmem:[#allocation8 + $0x28] sm:$0xff]   ;;  %v4289_v17 = vld [vmem:[%s5026_s6 + $0x18] sm:$0xff]  }
  0xb8   : > { %3906 = vmatpush3.bf16.msra.mxu0 %v4279_v1  ;;  %4152 = vmatpush3.bf16.msra.mxu1 %v4279_v1  ;;  %v4303_v15 = vld [vmem:[#allocation8 + $0x30] sm:$0xff]   ;;  %v4297_v18 = vld [vmem:[%s5026_s6 + $0x58] sm:$0xff]   ;;  %v4290_v19 = vld [vmem:[%s5026_s6 + $0x20] sm:$0xff]   ;;  %p4637_p1 = pnand %p4636_p13, %p5776_p2 }
  0xb9   : > { %3907 = vmatprep.subr.bf16.mxu0 %v4280_v2  ;;  %4145 = vmatprep.subr.bf16.mxu1 %v4280_v2  ;;  %v4298_v20 = vld [vmem:[%s5026_s6 + $0x60] sm:$0xff]   ;;  %v4306_v22 = vld [vmem:[#allocation8 + $0x18] sm:$0xff]   ;;  %v4291_v23 = vld [vmem:[%s5026_s6 + $0x28] sm:$0xff]  }
  0xba   : > { %v4305_v21 = vld [vmem:[#allocation8 + $0x20] sm:$0xff]   ;;  %v4299_v24 = vld [vmem:[%s5026_s6 + $0x68] sm:$0xff]   ;;  %v4292_v25 = vld [vmem:[%s5026_s6 + $0x30] sm:$0xff]   ;;  %p4638_p6 = pneg %p4637_p1 }
  0xbb   : > { %v4300_v26 = vld [vmem:[%s5026_s6 + $0x70] sm:$0xff]   ;;  %v4293_v27 = vld [vmem:[%s5026_s6 + $0x38] sm:$0xff]   ;;  %v4308_v30 = vld [vmem:[#allocation8 + $0x8] sm:$0xff]  }
  0xbc   : > { %3908 = vmatpush3.bf16.msra.mxu0 %v4280_v2  ;;  %4153 = vmatpush3.bf16.msra.mxu1 %v4280_v2  ;;  %v4301_v28 = vld [vmem:[%s5026_s6 + $0x78] sm:$0xff]   ;;  %v4307_v29 = vld [vmem:[#allocation8 + $0x10] sm:$0xff]   ;;  %v4309_v31 = vld [vmem:[#allocation8] sm:$0xff]   ;;  %s4639_s6 = sshll.u32 %s4734_s18, 4  ;;  %s4640_s6 = int_to_ptr.vmem [resolvable:$false] %s4639_s6 }
  0xbd   : > { %3909 = vmatprep.subr.bf16.mxu0 %v4281_v3  ;;  %4146 = vmatprep.subr.bf16.mxu1 %v4281_v3  ;;  %v4310_v32 = vld [vmem:[#allocation10 + $0x70] ss:$8 sps:$4 sm:$0xff]   ;;  %v4312_v33 = vld [vmem:[#allocation10 + $0x74] ss:$8 sps:$4 sm:$0xff]   ;;  %v4315_v34 = vld [vmem:[#allocation10 + $0x64] ss:$8 sps:$4 sm:$0xff]   ;;  %p4642_p12 = scmp.lt.s32.totalorder %s5683_s5, %s4640_s6 }
  0xbe   : > { %v4313_v35 = vld [vmem:[#allocation10 + $0x60] ss:$8 sps:$4 sm:$0xff]   ;;  %v4318_v36 = vld [vmem:[#allocation10 + $0x54] ss:$8 sps:$4 sm:$0xff]   ;;  %v4316_v37 = vld [vmem:[#allocation10 + $0x50] ss:$8 sps:$4 sm:$0xff]  }
  0xbf   : > { %v4321_v38 = vld [vmem:[#allocation10 + $0x44] ss:$8 sps:$4 sm:$0xff]   ;;  %v4319_v39 = vld [vmem:[#allocation10 + $0x40] ss:$8 sps:$4 sm:$0xff]   ;;  %v4324_v40 = vld [vmem:[#allocation10 + $0x34] ss:$8 sps:$4 sm:$0xff]  }
  0xc0   : > { %3910 = vmatpush3.bf16.msra.mxu0 %v4281_v3  ;;  %4154 = vmatpush3.bf16.msra.mxu1 %v4281_v3  ;;  %v4322_v41 = vld [vmem:[#allocation10 + $0x30] ss:$8 sps:$4 sm:$0xff]   ;;  %v5077_v45 = vld [vmem:[%s5736_s8] sm:$0xff]  ;;  %s4641_s4 = scalar_lea.vmem %s4640_s6, 16384 }
  0xc1   : > { %3911 = vmatprep.subr.bf16.mxu0 %v4282_v5  ;;  %4147 = vmatprep.subr.bf16.mxu1 %v4282_v5  ;;  %v5082_v48 = vrot.slane %v5077_v45, %v533_v44  ;;  %p4643_p7 = scmp.lt.s32.totalorder %s4641_s4, %s4635_s28 }
  0xc3   : > { %p4644_p3 = por %p4643_p7, %p4642_p12 }
  0xc4   : > { %3912 = vmatpush3.bf16.msra.mxu0 %v4282_v5  ;;  %4155 = vmatpush3.bf16.msra.mxu1 %v4282_v5 }
  0xc5   : > { %3913 = vmatprep.subr.bf16.mxu0 %v4283_v6  ;;  %4148 = vmatprep.subr.bf16.mxu1 %v4283_v6  ;;  %p4645_p11 = pnand %p4644_p3, %p4638_p6 }
  0xc8   : > { %3914 = vmatpush3.bf16.msra.mxu0 %v4283_v6  ;;  %4156 = vmatpush3.bf16.msra.mxu1 %v4283_v6 }
  0xc9   : > { %3915 = vmatprep.subr.bf16.mxu0 %v4284_v8  ;;  %4149 = vmatprep.subr.bf16.mxu1 %v4284_v8 }
  0xcc   : > { %3916 = vmatpush3.bf16.msra.mxu0 %v4284_v8  ;;  %4157 = vmatpush3.bf16.msra.mxu1 %v4284_v8 }
  0xcd   : > { %3917 = vmatprep.subr.bf16.mxu0 %v4285_v9  ;;  %4150 = vmatprep.subr.bf16.mxu1 %v4285_v9 }
  0xd0   : > { %3918 = vmatpush3.bf16.msra.mxu0 %v4285_v9  ;;  %4158 = vmatpush3.bf16.msra.mxu1 %v4285_v9 }
  0xd1   : > { %3951 = vmatprep.subr.bf16.mxu1 %v4302_v12  ;;  %1261 = vmatprep.subr.bf16.mxu0 %v4312_v33 }
  0xd3   : > { %3920 = vmatmul.mubr.bf16.vlgmr.msra.gmra.mxu0 %v4287_v10  ;;  %3936 = vmatmul.mubr.bf16.vlgmr.msra.gmra.mxu1 %v4295_v11 }
  0xd4   : > { %3923 = vmatprep.mubr.bf16.mxu0 %v4288_v13  ;;  %3939 = vmatprep.mubr.bf16.mxu1 %v4296_v14 }
  0xd5   : > { %3952 = vmatpush3.bf16.msra.mxu1 %v4302_v12  ;;  %1262 = vmatpush1.bf16.msra.mxu0 %v4310_v32 }
  0xd6   : > { %3953 = vmatprep.subr.bf16.mxu1 %v4303_v15  ;;  %1263 = vmatprep.subr.bf16.mxu0 %v4315_v34 }
  0xd9   : > { %3954 = vmatpush3.bf16.msra.mxu1 %v4303_v15  ;;  %1264 = vmatpush1.bf16.msra.mxu0 %v4313_v35 }
  0xda   : > { %3955 = vmatprep.subr.bf16.mxu1 %v4304_v16  ;;  %1265 = vmatprep.subr.bf16.mxu0 %v4318_v36 }
  0xdb   : > { %3924 = vmatmul.mubr.bf16.gmra.mxu0 %v4289_v17  ;;  %3940 = vmatmul.mubr.bf16.gmra.mxu1 %v4297_v18 }
  0xdc   : > { %3927 = vmatprep.mubr.bf16.mxu0 %v4290_v19  ;;  %3943 = vmatprep.mubr.bf16.mxu1 %v4298_v20 }
  0xdd   : > { %3956 = vmatpush3.bf16.msra.mxu1 %v4304_v16  ;;  %1266 = vmatpush1.bf16.msra.mxu0 %v4316_v37 }
  0xde   : > { %3957 = vmatprep.subr.bf16.mxu1 %v4305_v21  ;;  %1267 = vmatprep.subr.bf16.mxu0 %v4321_v38 }
  0xe1   : > { %3958 = vmatpush3.bf16.msra.mxu1 %v4305_v21  ;;  %1268 = vmatpush1.bf16.msra.mxu0 %v4319_v39 }
  0xe2   : > { %3959 = vmatprep.subr.bf16.mxu1 %v4306_v22  ;;  %1269 = vmatprep.subr.bf16.mxu0 %v4324_v40 }
  0xe3   : > { %3928 = vmatmul.mubr.bf16.gmra.mxu0 %v4291_v23  ;;  %3944 = vmatmul.mubr.bf16.gmra.mxu1 %v4299_v24 }
  0xe4   : > { %3931 = vmatprep.mubr.bf16.mxu0 %v4292_v25  ;;  %3947 = vmatprep.mubr.bf16.mxu1 %v4300_v26 }
  0xe5   : > { %3960 = vmatpush3.bf16.msra.mxu1 %v4306_v22  ;;  %1270 = vmatpush1.bf16.msra.mxu0 %v4322_v41 }
  0xe6   : > { %3961 = vmatprep.subr.bf16.mxu1 %v4307_v29 }
  0xe9   : > { %3962 = vmatpush3.bf16.msra.mxu1 %v4307_v29 }
  0xea   : > { %3963 = vmatprep.subr.bf16.mxu1 %v4308_v30 }
  0xeb   : > { %3932 = vmatmul.mubr.bf16.gmra.mxu0 %v4293_v27  ;;  %3948 = vmatmul.mubr.bf16.gmra.mxu1 %v4301_v28 }
  0xed   : > { %3964 = vmatpush3.bf16.msra.mxu1 %v4308_v30 }
  0xee   : > { %3965 = vmatprep.subr.bf16.mxu1 %v4309_v31 }
  0xf1   : > { %3966 = vmatpush3.bf16.msra.mxu1 %v4309_v31 }
 0x193   : > { %v3921_v46 = vpop.f32.mrf.mxu0  ;;  %v5079_v47 = vpop.f32.mrf.mxu1 }
 0x194   : > { %v722_v55 = vadd.f32 %v3921_v46, %v5082_v48 }
 0x195   : > { %v713_v49 = vpop.f32.mrf.mxu0  ;;  %v777_v50 = vpop.f32.mrf.mxu1 }
 0x196   : > { %v714_v53 = vadd.f32 %v713_v49, %v5082_v48  ;;  %v842_v0 = vmax.f32 %v722_v55, 0.0  ;;  %v778_v36 = vadd.f32 %v777_v50, %v5082_v48 }
 0x197   : > { %v3922_v51 = vpop.f32.mrf.mxu0  ;;  %v5084_v52 = vpop.f32.mrf.mxu1 }
 0x198   : > { %v725_v54 = vadd.f32 %v3922_v51, %v5082_v48  ;;  %v840_v62 = vmax.f32 %v714_v53, 0.0  ;;  %v856_v49 = vmax.f32 %v778_v36, 0.0  ;;  %v4330_v36 = vld [vmem:[#allocation10 + $0x14] ss:$8 sps:$4 sm:$0xff]  }
 0x199   : > { %v716_v56 = vpop.f32.mrf.mxu0  ;;  %v780_v57 = vpop.f32.mrf.mxu1 }
 0x19a   : > { %v717_v58 = vadd.f32 %v716_v56, %v5082_v48  ;;  %v843_v59 = vmax.f32 %v725_v54, 0.0  ;;  %v781_v40 = vadd.f32 %v780_v57, %v5082_v48  ;;  %v789_v57 = vadd.f32 %v5084_v52, %v5082_v48 }
 0x19b   : > { %v3925_v60 = vpop.f32.mrf.mxu0  ;;  %v5090_v61 = vpop.f32.mrf.mxu1 }
 0x19c   : > { %v841_v63 = vmax.f32 %v717_v58, 0.0  ;;  %v738_v1 = vadd.f32 %v3925_v60, %v5082_v48  ;;  %v873_v5 = vpack.c.bf16 %v843_v59, %v842_v0  ;;  %v857_v50 = vmax.f32 %v781_v40, 0.0 }
 0x19d   : > { %v729_v2 = vpop.f32.mrf.mxu0  ;;  %v793_v7 = vpop.f32.mrf.mxu1  ;;  %v786_v59 = vadd.f32 %v5079_v47, %v5082_v48  ;;  %v802_v52 = vadd.f32 %v5090_v61, %v5082_v48  ;;  %v906_v40 = vsub.s32 1, %v5071_v43 }
 0x19e   : > { %v872_v3 = vpack.c.bf16 %v841_v63, %v840_v62  ;;  %v730_v4 = vadd.f32 %v729_v2, %v5082_v48  ;;  %v846_v9 = vmax.f32 %v738_v1, 0.0  ;;  %v880_v63 = vpack.c.bf16 %v857_v50, %v856_v49 }
 0x19f   : > { %v3926_v6 = vpop.f32.mrf.mxu0  ;;  %v3942_v15 = vpop.f32.mrf.mxu1  ;;  %v794_v0 = vadd.f32 %v793_v7, %v5082_v48 }
 0x1a0   : > { %v741_v8 = vadd.f32 %v3926_v6, %v5082_v48  ;;  %3967 = vmatprep.mubr.bf16.mxu1 %v872_v3  ;;  %v844_v11 = vmax.f32 %v730_v4, 0.0  ;;  %v858_v3 = vmax.f32 %v786_v59, 0.0  ;;  %v859_v4 = vmax.f32 %v789_v57, 0.0 }
 0x1a1   : > { %v732_v10 = vpop.f32.mrf.mxu0  ;;  %3968 = vmatmul.mubr.bf16.vlgmr.msra.gmra.mxu1 %v873_v5  ;;  %v796_v23 = vpop.f32.mrf.mxu1  ;;  %v860_v5 = vmax.f32 %v794_v0, 0.0 }
 0x1a2   : > { %v847_v12 = vmax.f32 %v741_v8, 0.0  ;;  %v733_v13 = vadd.f32 %v732_v10, %v5082_v48  ;;  %v797_v1 = vadd.f32 %v796_v23, %v5082_v48  ;;  %v881_v47 = vpack.c.bf16 %v859_v4, %v858_v3 }
 0x1a3   : > { %v3929_v14 = vpop.f32.mrf.mxu0  ;;  %v3945_v27 = vpop.f32.mrf.mxu1 }
 0x1a4   : > { %v845_v16 = vmax.f32 %v733_v13, 0.0  ;;  %v875_v17 = vpack.c.bf16 %v847_v12, %v846_v9  ;;  %v754_v18 = vadd.f32 %v3929_v14, %v5082_v48  ;;  %v861_v6 = vmax.f32 %v797_v1, 0.0 }
 0x1a5   : > { %v745_v19 = vpop.f32.mrf.mxu0  ;;  %v809_v37 = vpop.f32.mrf.mxu1  ;;  %v805_v9 = vadd.f32 %v3942_v15, %v5082_v48  ;;  %v862_v13 = vmax.f32 %v802_v52, 0.0 }
 0x1a6   : > { %v874_v20 = vpack.c.bf16 %v845_v16, %v844_v11  ;;  %v746_v21 = vadd.f32 %v745_v19, %v5082_v48  ;;  %v850_v25 = vmax.f32 %v754_v18, 0.0  ;;  %v882_v10 = vpack.c.bf16 %v861_v6, %v860_v5 }
 0x1a7   : > { %v3930_v22 = vpop.f32.mrf.mxu0  ;;  %v3946_v51 = vpop.f32.mrf.mxu1  ;;  %v810_v7 = vadd.f32 %v809_v37, %v5082_v48  ;;  %v863_v14 = vmax.f32 %v805_v9, 0.0  ;;  %v4328_v37 = vld [vmem:[#allocation10 + $0x10] ss:$8 sps:$4 sm:$0xff]  }
 0x1a8   : > { %3971 = vmatprep.mubr.bf16.mxu1 %v874_v20  ;;  %v757_v24 = vadd.f32 %v3930_v22, %v5082_v48  ;;  %v848_v28 = vmax.f32 %v746_v21, 0.0  ;;  %v818_v20 = vadd.f32 %v3945_v27, %v5082_v48  ;;  %v821_v61 = vadd.f32 %v3946_v51, %v5082_v48 }
 0x1a9   : > { %3972 = vmatmul.mubr.bf16.gmra.mxu1 %v875_v17  ;;  %v748_v26 = vpop.f32.mrf.mxu0  ;;  %v812_v60 = vpop.f32.mrf.mxu1  ;;  %v864_v16 = vmax.f32 %v810_v7, 0.0  ;;  %v883_v19 = vpack.c.bf16 %v863_v14, %v862_v13 }
 0x1aa   : > { %v851_v29 = vmax.f32 %v757_v24, 0.0  ;;  %v749_v30 = vadd.f32 %v748_v26, %v5082_v48  ;;  %v813_v11 = vadd.f32 %v812_v60, %v5082_v48  ;;  %v866_v23 = vmax.f32 %v818_v20, 0.0 }
 0x1ab   : > { %v3933_v31 = vpop.f32.mrf.mxu0  ;;  %v3949_v2 = vpop.f32.mrf.mxu1  ;;  %v867_v24 = vmax.f32 %v821_v61, 0.0 }
 0x1ac   : > { %v849_v32 = vmax.f32 %v749_v30, 0.0  ;;  %v877_v33 = vpack.c.bf16 %v851_v29, %v850_v25  ;;  %v770_v34 = vadd.f32 %v3933_v31, %v5082_v48  ;;  %v865_v17 = vmax.f32 %v813_v11, 0.0 }
 0x1ad   : > { %v761_v35 = vpop.f32.mrf.mxu0  ;;  %v825_v8 = vpop.f32.mrf.mxu1  ;;  %v834_v29 = vadd.f32 %v3949_v2, %v5082_v48 }
 0x1ae   : > { %v876_v38 = vpack.c.bf16 %v849_v32, %v848_v28  ;;  %v762_v39 = vadd.f32 %v761_v35, %v5082_v48  ;;  %v854_v44 = vmax.f32 %v770_v34, 0.0  ;;  %v884_v21 = vpack.c.bf16 %v865_v17, %v864_v16  ;;  %v4327_v34 = vld [vmem:[#allocation10 + $0x24] ss:$8 sps:$4 sm:$0xff]   ;;  %v4325_v35 = vld [vmem:[#allocation10 + $0x20] ss:$8 sps:$4 sm:$0xff]  }
 0x1af   : > { %v3934_v41 = vpop.f32.mrf.mxu0  ;;  %v3950_v12 = vpop.f32.mrf.mxu1  ;;  %v826_v15 = vadd.f32 %v825_v8, %v5082_v48  ;;  %v885_v28 = vpack.c.bf16 %v867_v24, %v866_v23  ;;  %v870_v27 = vmax.f32 %v834_v29, 0.0  ;;  %1271 = vmatprep.subr.bf16.mxu0 %v4327_v34 }
 0x1b0   : > { %3975 = vmatprep.mubr.bf16.mxu1 %v876_v38  ;;  %v773_v42 = vadd.f32 %v3934_v41, %v5082_v48  ;;  %v852_v53 = vmax.f32 %v762_v39, 0.0  ;;  %v837_v30 = vadd.f32 %v3950_v12, %v5082_v48  ;;  %1272 = vmatpush1.bf16.msra.mxu0 %v4325_v35  ;;  %v4333_v38 = vld [vmem:[#allocation10 + $0x4] ss:$8 sps:$4 sm:$0xff]   ;;  %v4331_v39 = vld [vmem:[#allocation10] ss:$8 sps:$4 sm:$0xff]  }
 0x1b1   : > { %3976 = vmatmul.mubr.bf16.gmra.mxu1 %v877_v33  ;;  %v764_v46 = vpop.f32.mrf.mxu0  ;;  %v828_v18 = vpop.f32.mrf.mxu1  ;;  %v868_v25 = vmax.f32 %v826_v15, 0.0  ;;  %1273 = vmatprep.subr.bf16.mxu0 %v4330_v36 }
 0x1b2   : > { %v855_v54 = vmax.f32 %v773_v42, 0.0  ;;  %v765_v55 = vadd.f32 %v764_v46, %v5082_v48  ;;  %v829_v22 = vadd.f32 %v828_v18, %v5082_v48  ;;  %v871_v32 = vmax.f32 %v837_v30, 0.0 }
 0x1b3   : > { %v4733_v48 = vmov 0  }
 0x1b4   : > { %v853_v56 = vmax.f32 %v765_v55, 0.0  ;;  %v879_v58 = vpack.c.bf16 %v855_v54, %v854_v44  ;;  %v869_v26 = vmax.f32 %v829_v22, 0.0  ;;  %v887_v33 = vpack.c.bf16 %v871_v32, %v870_v27  ;;  %1274 = vmatpush1.bf16.msra.mxu0 %v4328_v37  ;;  %1293 = vmatprep.mubr.bf16.mxu0 %v4733_v48 }
 0x1b5   : > { %1275 = vmatprep.subr.bf16.mxu0 %v4333_v38  ;;  %v5126_v44 = vrot.slane %v5077_v45, %v906_v40 }
 0x1b6   : > { %v878_v62 = vpack.c.bf16 %v853_v56, %v852_v53  ;;  %v886_v31 = vpack.c.bf16 %v869_v26, %v868_v25 }
 0x1b8   : > { %3979 = vmatprep.mubr.bf16.mxu1 %v878_v62  ;;  %1276 = vmatpush1.bf16.msra.mxu0 %v4331_v39 }
 0x1b9   : > { %3980 = vmatmul.mubr.bf16.gmra.mxu1 %v879_v58 }
 0x1ba   : > { %3983 = vmatprep.mubr.bf16.mxu1 %v880_v63 }
 0x1c1   : > { %3984 = vmatmul.mubr.bf16.gmra.mxu1 %v881_v47 }
 0x1c2   : > { %3987 = vmatprep.mubr.bf16.mxu1 %v882_v10 }
 0x1c9   : > { %3988 = vmatmul.mubr.bf16.gmra.mxu1 %v883_v19 }
 0x1ca   : > { %3991 = vmatprep.mubr.bf16.mxu1 %v884_v21 }
 0x1d1   : > { %3992 = vmatmul.mubr.bf16.gmra.mxu1 %v885_v28 }
 0x1d2   : > { %3995 = vmatprep.mubr.bf16.mxu1 %v886_v31 }
 0x1d9   : > { %3996 = vmatmul.mubr.bf16.gmra.mxu1 %v887_v33 }
 0x261   : > { %v3969_v41 = vpop.f32.mrf.mxu1 }
 0x262   : > { %v999_v60 = vadd.f32 %v3969_v41, %v5126_v44 }
 0x263   : > { %v990_v42 = vpop.f32.mrf.mxu1 }
 0x264   : > { %v991_v49 = vadd.f32 %v990_v42, %v5126_v44  ;;  %v1119_v0 = vmax.f32 %v999_v60, 0.0 }
 0x265   : > { %v3970_v46 = vpop.f32.mrf.mxu1 }
 0x266   : > { %v1117_v55 = vmax.f32 %v991_v49, 0.0  ;;  %v1002_v58 = vadd.f32 %v3970_v46, %v5126_v44 }
 0x267   : > { %v993_v51 = vpop.f32.mrf.mxu1 }
 0x268   : > { %v994_v53 = vadd.f32 %v993_v51, %v5126_v44  ;;  %v1120_v62 = vmax.f32 %v1002_v58, 0.0 }
 0x269   : > { %v3973_v54 = vpop.f32.mrf.mxu1 }
 0x26a   : > { %v1118_v50 = vmax.f32 %v994_v53, 0.0  ;;  %v1150_v1 = vpack.c.bf16 %v1120_v62, %v1119_v0  ;;  %v1015_v10 = vadd.f32 %v3973_v54, %v5126_v44 }
 0x26b   : > { %v1006_v56 = vpop.f32.mrf.mxu1 }
 0x26c   : > { %v1149_v59 = vpack.c.bf16 %v1118_v50, %v1117_v55  ;;  %v1007_v4 = vadd.f32 %v1006_v56, %v5126_v44  ;;  %v1123_v12 = vmax.f32 %v1015_v10, 0.0 }
 0x26d   : > { %v3974_v57 = vpop.f32.mrf.mxu1 }
 0x26e   : > { %1294 = vmatmul.mubr.bf16.vlgmr.msra.gmra.mxu0 %v1149_v59  ;;  %v1121_v8 = vmax.f32 %v1007_v4, 0.0  ;;  %v1018_v47 = vadd.f32 %v3974_v57, %v5126_v44 }
 0x26f   : > { %1303 = vmatprep.mubr.bf16.mxu0 %v4733_v48  ;;  %v1009_v63 = vpop.f32.mrf.mxu1 }
 0x270   : > { %v1010_v2 = vadd.f32 %v1009_v63, %v5126_v44  ;;  %v1124_v7 = vmax.f32 %v1018_v47, 0.0 }
 0x271   : > { %v3977_v3 = vpop.f32.mrf.mxu1 }
 0x272   : > { %v1122_v5 = vmax.f32 %v1010_v2, 0.0  ;;  %v1152_v13 = vpack.c.bf16 %v1124_v7, %v1123_v12  ;;  %v1031_v61 = vadd.f32 %v3977_v3, %v5126_v44  ;;  %v4337_v12 = vld [vmem:[#allocation11 + $0x20] sm:$0xff]  }
 0x273   : > { %v1022_v6 = vpop.f32.mrf.mxu1 }
 0x274   : > { %v1151_v52 = vpack.c.bf16 %v1122_v5, %v1121_v8  ;;  %v1023_v14 = vadd.f32 %v1022_v6, %v5126_v44  ;;  %v1127_v23 = vmax.f32 %v1031_v61, 0.0  ;;  %v4335_v5 = vld [vmem:[#allocation11 + $0x30] sm:$0xff]  }
 0x275   : > { %v3978_v9 = vpop.f32.mrf.mxu1 }
 0x276   : > { %1304 = vmatmul.mubr.bf16.gmra.mxu0 %v1150_v1  ;;  %v1125_v18 = vmax.f32 %v1023_v14, 0.0  ;;  %v1034_v21 = vadd.f32 %v3978_v9, %v5126_v44  ;;  %v4334_v1 = vld [vmem:[#allocation11 + $0x38] sm:$0xff]   ;;  %v4336_v9 = vld [vmem:[#allocation11 + $0x28] sm:$0xff]  }
 0x277   : > { %1313 = vmatprep.mubr.bf16.mxu0 %v4733_v48  ;;  %v1025_v11 = vpop.f32.mrf.mxu1  ;;  %3999 = vmatprep.subr.bf16.mxu1 %v4334_v1 }
 0x278   : > { %v1026_v16 = vadd.f32 %v1025_v11, %v5126_v44  ;;  %v1128_v24 = vmax.f32 %v1034_v21, 0.0  ;;  %4000 = vmatpush3.bf16.msra.mxu1 %v4334_v1  ;;  %v4339_v21 = vld [vmem:[#allocation11 + $0x10] sm:$0xff]  }
 0x279   : > { %v3981_v17 = vpop.f32.mrf.mxu1  ;;  %4001 = vmatprep.subr.bf16.mxu1 %v4335_v5 }
 0x27a   : > { %v1126_v19 = vmax.f32 %v1026_v16, 0.0  ;;  %v1154_v26 = vpack.c.bf16 %v1128_v24, %v1127_v23  ;;  %v1047_v33 = vadd.f32 %v3981_v17, %v5126_v44 }
 0x27b   : > { %v1038_v20 = vpop.f32.mrf.mxu1 }
 0x27c   : > { %v1153_v15 = vpack.c.bf16 %v1126_v19, %v1125_v18  ;;  %v1039_v28 = vadd.f32 %v1038_v20, %v5126_v44  ;;  %v1131_v37 = vmax.f32 %v1047_v33, 0.0  ;;  %4002 = vmatpush3.bf16.msra.mxu1 %v4335_v5  ;;  %v4338_v18 = vld [vmem:[#allocation11 + $0x18] sm:$0xff]  }
 0x27d   : > { %v3982_v22 = vpop.f32.mrf.mxu1  ;;  %4003 = vmatprep.subr.bf16.mxu1 %v4336_v9 }
 0x27e   : > { %1314 = vmatmul.mubr.bf16.gmra.mxu0 %v1151_v52  ;;  %v1129_v31 = vmax.f32 %v1039_v28, 0.0  ;;  %v1050_v34 = vadd.f32 %v3982_v22, %v5126_v44 }
 0x27f   : > { %1323 = vmatprep.mubr.bf16.mxu0 %v4733_v48  ;;  %v1041_v25 = vpop.f32.mrf.mxu1 }
 0x280   : > { %v1042_v29 = vadd.f32 %v1041_v25, %v5126_v44  ;;  %v1132_v38 = vmax.f32 %v1050_v34, 0.0  ;;  %4004 = vmatpush3.bf16.msra.mxu1 %v4336_v9  ;;  %v4340_v25 = vld [vmem:[#allocation11 + $0x8] sm:$0xff]  }
 0x281   : > { %v3985_v30 = vpop.f32.mrf.mxu1  ;;  %4005 = vmatprep.subr.bf16.mxu1 %v4337_v12 }
 0x282   : > { %v1130_v27 = vmax.f32 %v1042_v29, 0.0  ;;  %v1156_v40 = vpack.c.bf16 %v1132_v38, %v1131_v37  ;;  %v1063_v54 = vadd.f32 %v3985_v30, %v5126_v44  ;;  %v4341_v30 = vld [vmem:[#allocation11] sm:$0xff]  }
 0x283   : > { %v1054_v32 = vpop.f32.mrf.mxu1 }
 0x284   : > { %v1155_v35 = vpack.c.bf16 %v1130_v27, %v1129_v31  ;;  %v1055_v41 = vadd.f32 %v1054_v32, %v5126_v44  ;;  %v1135_v58 = vmax.f32 %v1063_v54, 0.0  ;;  %4006 = vmatpush3.bf16.msra.mxu1 %v4337_v12 }
 0x285   : > { %v3986_v36 = vpop.f32.mrf.mxu1  ;;  %4007 = vmatprep.subr.bf16.mxu1 %v4338_v18 }
 0x286   : > { %1324 = vmatmul.mubr.bf16.gmra.mxu0 %v1152_v13  ;;  %v1133_v49 = vmax.f32 %v1055_v41, 0.0  ;;  %v1066_v55 = vadd.f32 %v3986_v36, %v5126_v44  ;;  %v1456_v41 = vsub.s32 2, %v5071_v43 }
 0x287   : > { %1333 = vmatprep.mubr.bf16.mxu0 %v4733_v48  ;;  %v1057_v39 = vpop.f32.mrf.mxu1 }
 0x288   : > { %v1058_v42 = vadd.f32 %v1057_v39, %v5126_v44  ;;  %v1136_v59 = vmax.f32 %v1066_v55, 0.0  ;;  %4008 = vmatpush3.bf16.msra.mxu1 %v4338_v18 }
 0x289   : > { %v3989_v46 = vpop.f32.mrf.mxu1  ;;  %4009 = vmatprep.subr.bf16.mxu1 %v4339_v21 }
 0x28a   : > { %v1134_v51 = vmax.f32 %v1058_v42, 0.0  ;;  %v1158_v60 = vpack.c.bf16 %v1136_v59, %v1135_v58  ;;  %v1079_v6 = vadd.f32 %v3989_v46, %v5126_v44  ;;  %v1492_v42 = vsub.s32 3, %v5071_v43 }
 0x28b   : > { %v1070_v53 = vpop.f32.mrf.mxu1  ;;  %v5178_v46 = vrot.slane %v5077_v45, %v1456_v41 }
 0x28c   : > { %v1157_v50 = vpack.c.bf16 %v1134_v51, %v1133_v49  ;;  %v1071_v62 = vadd.f32 %v1070_v53, %v5126_v44  ;;  %v1139_v10 = vmax.f32 %v1079_v6, 0.0  ;;  %4010 = vmatpush3.bf16.msra.mxu1 %v4339_v21  ;;  %v5182_v49 = vrot.slane %v5077_v45, %v1492_v42 }
 0x28d   : > { %v3990_v56 = vpop.f32.mrf.mxu1  ;;  %4011 = vmatprep.subr.bf16.mxu1 %v4340_v25 }
 0x28e   : > { %1334 = vmatmul.mubr.bf16.gmra.mxu0 %v1153_v15  ;;  %v1137_v2 = vmax.f32 %v1071_v62, 0.0  ;;  %v1082_v8 = vadd.f32 %v3990_v56, %v5126_v44 }
 0x28f   : > { %1343 = vmatprep.mubr.bf16.mxu0 %v4733_v48  ;;  %v1073_v57 = vpop.f32.mrf.mxu1 }
 0x290   : > { %v1074_v63 = vadd.f32 %v1073_v57, %v5126_v44  ;;  %v1140_v7 = vmax.f32 %v1082_v8, 0.0  ;;  %4012 = vmatpush3.bf16.msra.mxu1 %v4340_v25 }
 0x291   : > { %v3993_v0 = vpop.f32.mrf.mxu1  ;;  %4013 = vmatprep.subr.bf16.mxu1 %v4341_v30 }
 0x292   : > { %v1138_v3 = vmax.f32 %v1074_v63, 0.0  ;;  %v1160_v13 = vpack.c.bf16 %v1140_v7, %v1139_v10  ;;  %v1095_v15 = vadd.f32 %v3993_v0, %v5126_v44 }
 0x293   : > { %v1086_v4 = vpop.f32.mrf.mxu1 }
 0x294   : > { %v1159_v47 = vpack.c.bf16 %v1138_v3, %v1137_v2  ;;  %v1087_v14 = vadd.f32 %v1086_v4, %v5126_v44  ;;  %4014 = vmatpush3.bf16.msra.mxu1 %v4341_v30 }
 0x295   : > { %v3994_v52 = vpop.f32.mrf.mxu1 }
 0x296   : > { %1344 = vmatmul.mubr.bf16.gmra.mxu0 %v1154_v26  ;;  %v1141_v19 = vmax.f32 %v1087_v14, 0.0  ;;  %v1098_v22 = vadd.f32 %v3994_v52, %v5126_v44  ;;  %v1143_v26 = vmax.f32 %v1095_v15, 0.0 }
 0x297   : > { %1353 = vmatprep.mubr.bf16.mxu0 %v4733_v48  ;;  %v1089_v11 = vpop.f32.mrf.mxu1 }
 0x298   : > { %v1090_v16 = vadd.f32 %v1089_v11, %v5126_v44  ;;  %v1144_v28 = vmax.f32 %v1098_v22, 0.0 }
 0x299   : > { %v3997_v17 = vpop.f32.mrf.mxu1 }
 0x29a   : > { %v1142_v20 = vmax.f32 %v1090_v16, 0.0  ;;  %v1162_v31 = vpack.c.bf16 %v1144_v28, %v1143_v26 }
 0x29b   : > { %v1102_v61 = vpop.f32.mrf.mxu1 }
 0x29c   : > { %v1161_v23 = vpack.c.bf16 %v1142_v20, %v1141_v19  ;;  %v1103_v27 = vadd.f32 %v1102_v61, %v5126_v44 }
 0x29d   : > { %v3998_v24 = vpop.f32.mrf.mxu1 }
 0x29e   : > { %1354 = vmatmul.mubr.bf16.gmra.mxu0 %v1155_v35  ;;  %v1145_v33 = vmax.f32 %v1103_v27, 0.0  ;;  %v1111_v35 = vadd.f32 %v3997_v17, %v5126_v44  ;;  %v1114_v36 = vadd.f32 %v3998_v24, %v5126_v44 }
 0x29f   : > { %1363 = vmatprep.mubr.bf16.mxu0 %v4733_v48  ;;  %v1105_v29 = vpop.f32.mrf.mxu1 }
 0x2a0   : > { %v1106_v32 = vadd.f32 %v1105_v29, %v5126_v44  ;;  %v1147_v38 = vmax.f32 %v1111_v35, 0.0  ;;  %v1148_v39 = vmax.f32 %v1114_v36, 0.0 }
 0x2a2   : > { %v1146_v34 = vmax.f32 %v1106_v32, 0.0  ;;  %v3768_v32 = vld [vmem:[%s5033_s25 + $0x8] sm:$0xff]  }
 0x2a3   : > { %v3710_v41 = vunpack.c.l.bf16 %v3768_v32 }
 0x2a4   : > { %v1163_v37 = vpack.c.bf16 %v1146_v34, %v1145_v33 }
 0x2a6   : > { %1364 = vmatmul.mubr.bf16.gmra.mxu0 %v1156_v40  ;;  %v1164_v40 = vpack.c.bf16 %v1148_v39, %v1147_v38 }
 0x2a7   : > { %1373 = vmatprep.mubr.bf16.mxu0 %v4733_v48 }
 0x2ae   : > { %1374 = vmatmul.mubr.bf16.gmra.mxu0 %v1157_v50 }
 0x2af   : > { %1383 = vmatprep.mubr.bf16.mxu0 %v4733_v48 }
 0x2b6   : > { %1384 = vmatmul.mubr.bf16.gmra.mxu0 %v1158_v60 }
 0x2b7   : > { %1393 = vmatprep.mubr.bf16.mxu0 %v4733_v48 }
 0x2be   : > { %1394 = vmatmul.mubr.bf16.gmra.mxu0 %v1159_v47 }
 0x2bf   : > { %1403 = vmatprep.mubr.bf16.mxu0 %v4733_v48 }
 0x2c6   : > { %1404 = vmatmul.mubr.bf16.gmra.mxu0 %v1160_v13  ;;  %v3705_v13 = vld [vmem:[%s5033_s25] sm:$0xff]  }
 0x2c7   : > { %1413 = vmatprep.mubr.bf16.mxu0 %v4733_v48  ;;  %v3706_v21 = vunpack.c.l.bf16 %v3705_v13  ;;  %v3707_v28 = vunpack.c.h.bf16 %v3705_v13 }
 0x2ce   : > { %1414 = vmatmul.mubr.bf16.gmra.mxu0 %v1161_v23 }
 0x2cf   : > { %1423 = vmatprep.mubr.bf16.mxu0 %v4733_v48 }
 0x2d6   : > { %1424 = vmatmul.mubr.bf16.gmra.mxu0 %v1162_v31 }
 0x2d7   : > { %1433 = vmatprep.mubr.bf16.mxu0 %v4733_v48 }
 0x2de   : > { %1434 = vmatmul.mubr.bf16.gmra.mxu0 %v1163_v37  ;;  %v5238_v37 = vld [vmem:[#allocation13 + $0x38] sm:$0xff]  }
 0x2df   : > { %1443 = vmatprep.mubr.bf16.mxu0 %v4733_v48  ;;  %4047 = vmatprep.subr.bf16.mxu1 %v5238_v37 }
 0x2e6   : > { %1444 = vmatmul.mubr.bf16.gmra.mxu0 %v1164_v40 }
 0x32e   : > { %v1295_v44 = vpop.f32.mrf.mxu0 }
 0x32f   : > { %v5185_v51 = vadd.f32 %v5178_v46, %v1295_v44 }
 0x330   : > { %v1297_v48 = vpop.f32.mrf.mxu0 }
 0x331   : > { %v3574_v53 = vpack.c.bf16 %v5185_v51, %v5185_v51  ;;  %v1494_v54 = vadd.f32 %v5182_v49, %v1297_v48 }
 0x332   : > { %v1299_v55 = vpop.f32.mrf.mxu0 }
 0x333   : > { %2677 = vst [vmem:[%s5190_s17] sm:$0xf] %v3574_v53  ;;  %v1526_v50 = vmul.f32 0.5, %v1494_v54  ;;  %v3606_v45 = vpack.c.bf16 %v1494_v54, %v1494_v54  ;;  %v5194_v56 = vadd.f32 %v5178_v46, %v1299_v55 }
 0x334   : > { %v1301_v58 = vpop.f32.mrf.mxu0 }
 0x335   : > { %v1558_v59 = vmul.f32 1.442695, %v1526_v50  ;;  %2837 = vst [vmem:[%s5190_s17 + $0x4] sm:$0xf] %v3606_v45  ;;  %v3575_v57 = vpack.c.bf16 %v5194_v56, %v5194_v56  ;;  %v1495_v60 = vadd.f32 %v5182_v49, %v1301_v58 }
 0x336   : > { %v1305_v62 = vpop.f32.mrf.mxu0 }
 0x337   : > { %4358 = vpow2.f32 %v1558_v59  ;;  %2678 = vst [vmem:[%s5190_s17 + $0x10] sm:$0xf] %v3575_v57  ;;  %v1527_v63 = vmul.f32 0.5, %v1495_v60  ;;  %v3607_v0 = vpack.c.bf16 %v1495_v60, %v1495_v60  ;;  %v5202_v1 = vadd.f32 %v5178_v46, %v1305_v62 }
 0x338   : > { %v1307_v2 = vpop.f32.mrf.mxu0  ;;  %v3711_v60 = vunpack.c.h.bf16 %v3768_v32 }
 0x339   : > { %v1560_v3 = vmul.f32 1.442695, %v1527_v63  ;;  %2838 = vst [vmem:[%s5190_s17 + $0x14] sm:$0xf] %v3607_v0  ;;  %v3576_v4 = vpack.c.bf16 %v5202_v1, %v5202_v1  ;;  %v1496_v5 = vadd.f32 %v5182_v49, %v1307_v2 }
 0x33a   : > { %v1309_v6 = vpop.f32.mrf.mxu0 }
 0x33b   : > { %4360 = vpow2.f32 %v1560_v3  ;;  %2679 = vst [vmem:[%s5190_s17 + $0x20] sm:$0xf] %v3576_v4  ;;  %v1528_v8 = vmul.f32 0.5, %v1496_v5  ;;  %v3608_v47 = vpack.c.bf16 %v1496_v5, %v1496_v5  ;;  %v5210_v52 = vadd.f32 %v5178_v46, %v1309_v6  ;;  %v3769_v3 = vld [vmem:[%s5033_s25 + $0x10] sm:$0xff]  }
 0x33c   : > { %v1311_v9 = vpop.f32.mrf.mxu0 }
 0x33d   : > { %v1562_v10 = vmul.f32 1.442695, %v1528_v8  ;;  %2839 = vst [vmem:[%s5190_s17 + $0x24] sm:$0xf] %v3608_v47  ;;  %v3577_v7 = vpack.c.bf16 %v5210_v52, %v5210_v52  ;;  %v1497_v11 = vadd.f32 %v5182_v49, %v1311_v9 }
 0x33e   : > { %v1315_v12 = vpop.f32.mrf.mxu0 }
 0x33f   : > { %4362 = vpow2.f32 %v1562_v10  ;;  %2680 = vst [vmem:[%s5190_s17 + $0x30] sm:$0xf] %v3577_v7  ;;  %v1529_v14 = vmul.f32 0.5, %v1497_v11  ;;  %v3609_v16 = vpack.c.bf16 %v1497_v11, %v1497_v11  ;;  %v5219_v17 = vadd.f32 %v5178_v46, %v1315_v12 }
 0x340   : > { %v1317_v18 = vpop.f32.mrf.mxu0  ;;  %v3714_v11 = vunpack.c.l.bf16 %v3769_v3 }
 0x341   : > { %v1564_v19 = vmul.f32 1.442695, %v1529_v14  ;;  %2840 = vst [vmem:[%s5190_s17 + $0x34] sm:$0xf] %v3609_v16  ;;  %v3578_v20 = vpack.c.bf16 %v5219_v17, %v5219_v17  ;;  %v1498_v61 = vadd.f32 %v5182_v49, %v1317_v18 }
 0x342   : > { %v1319_v15 = vpop.f32.mrf.mxu0 }
 0x343   : > { %4364 = vpow2.f32 %v1564_v19  ;;  %2681 = vst [vmem:[%s5190_s17 + $0x40] sm:$0xf] %v3578_v20  ;;  %v1530_v22 = vmul.f32 0.5, %v1498_v61  ;;  %v3610_v23 = vpack.c.bf16 %v1498_v61, %v1498_v61  ;;  %v5227_v24 = vadd.f32 %v5178_v46, %v1319_v15 }
 0x344   : > { %v4359_v25 = vpop.eup %4358  ;;  %v1321_v26 = vpop.f32.mrf.mxu0 }
 0x345   : > { %v1566_v29 = vmul.f32 1.442695, %v1530_v22  ;;  %2841 = vst [vmem:[%s5190_s17 + $0x44] sm:$0xf] %v3610_v23  ;;  %v3579_v30 = vpack.c.bf16 %v5227_v24, %v5227_v24  ;;  %v1499_v31 = vadd.f32 %v5182_v49, %v1321_v26  ;;  %v1686_v27 = vmul.f32 %v4359_v25, %v3706_v21 }
 0x346   : > { %v1325_v33 = vpop.f32.mrf.mxu0  ;;  %v3715_v23 = vunpack.c.h.bf16 %v3769_v3  ;;  %v5304_v3 = vld [vmem:[%s5033_s25 + $0x20] sm:$0xff]  }
 0x347   : > { %4366 = vpow2.f32 %v1566_v29  ;;  %2682 = vst [vmem:[%s5190_s17 + $0x50] sm:$0xf] %v3579_v30  ;;  %v1531_v34 = vmul.f32 0.5, %v1499_v31  ;;  %v3611_v35 = vpack.c.bf16 %v1499_v31, %v1499_v31  ;;  %v5236_v36 = vadd.f32 %v5178_v46, %v1325_v33  ;;  %v5278_v30 = vld [vmem:[%s5033_s25 + $0x18] sm:$0xff]   ;;  %v4343_v33 = vld [vmem:[#allocation13 + $0x30] sm:$0xff]  }
 0x348   : > { %v4361_v38 = vpop.eup %4360  ;;  %v1327_v39 = vpop.f32.mrf.mxu0  ;;  %v1718_v40 = vadd.f32 %v1686_v27, %v5185_v51 }
 0x349   : > { %v1568_v42 = vmul.f32 1.442695, %v1531_v34  ;;  %2842 = vst [vmem:[%s5190_s17 + $0x54] sm:$0xf] %v3611_v35  ;;  %v3580_v44 = vpack.c.bf16 %v5236_v36, %v5236_v36  ;;  %v1500_v48 = vadd.f32 %v5182_v49, %v1327_v39  ;;  %v1687_v53 = vmul.f32 %v4361_v38, %v3707_v28 }
 0x34a   : > { %v1329_v54 = vpop.f32.mrf.mxu0  ;;  %v3638_v55 = vpack.c.bf16 %v1718_v40, %v1718_v40 }
 0x34b   : > { %4368 = vpow2.f32 %v1568_v42  ;;  %2683 = vst [vmem:[%s5190_s17 + $0x60] sm:$0xf] %v3580_v44  ;;  %v1532_v50 = vmul.f32 0.5, %v1500_v48  ;;  %v3612_v51 = vpack.c.bf16 %v1500_v48, %v1500_v48  ;;  %v5248_v45 = vadd.f32 %v5178_v46, %v1329_v54 }
 0x34c   : > { %v4363_v58 = vpop.eup %4362  ;;  %v1331_v59 = vpop.f32.mrf.mxu0  ;;  %v1719_v57 = vadd.f32 %v1687_v53, %v5194_v56  ;;  %2981 = vst [vmem:[%s5190_s17 + $0x8] sm:$0xf] %v3638_v55 }
 0x34d   : > { %v1570_v62 = vmul.f32 1.442695, %v1532_v50  ;;  %2843 = vst [vmem:[%s5190_s17 + $0x64] sm:$0xf] %v3612_v51  ;;  %v3581_v63 = vpack.c.bf16 %v5248_v45, %v5248_v45  ;;  %v1501_v0 = vadd.f32 %v5182_v49, %v1331_v59  ;;  %v1688_v2 = vmul.f32 %v4363_v58, %v3710_v41  ;;  %v4344_v50 = vld [vmem:[#allocation13 + $0x28] sm:$0xff]  }
 0x34e   : > { %v1335_v4 = vpop.f32.mrf.mxu0  ;;  %v1750_v5 = vpack.c.bf16 %v1719_v57, %v1718_v40  ;;  %v3639_v6 = vpack.c.bf16 %v1719_v57, %v1719_v57  ;;  %v3718_v41 = vunpack.c.l.bf16 %v5278_v30 }
 0x34f   : > { %4370 = vpow2.f32 %v1570_v62  ;;  %2684 = vst [vmem:[%s5190_s17 + $0x70] sm:$0xf] %v3581_v63  ;;  %v1533_v8 = vmul.f32 0.5, %v1501_v0  ;;  %v3613_v56 = vpack.c.bf16 %v1501_v0, %v1501_v0  ;;  %v5259_v47 = vadd.f32 %v5178_v46, %v1335_v4 }
 0x350   : > { %v4365_v9 = vpop.eup %4364  ;;  %4015 = vmatprep.mubr.bf16.mxu1 %v1750_v5  ;;  %2982 = vst [vmem:[%s5190_s17 + $0x18] sm:$0xf] %v3639_v6  ;;  %v1337_v10 = vpop.f32.mrf.mxu0  ;;  %v1720_v7 = vadd.f32 %v1688_v2, %v5202_v1  ;;  %v4345_v6 = vld [vmem:[#allocation13 + $0x20] sm:$0xff]  }
 0x351   : > { %v1572_v12 = vmul.f32 1.442695, %v1533_v8  ;;  %2844 = vst [vmem:[%s5190_s17 + $0x74] sm:$0xf] %v3613_v56  ;;  %v3582_v13 = vpack.c.bf16 %v5259_v47, %v5259_v47  ;;  %v1502_v14 = vadd.f32 %v5182_v49, %v1337_v10  ;;  %v1689_v16 = vmul.f32 %v4365_v9, %v3711_v60 }
 0x352   : > { %v1339_v18 = vpop.f32.mrf.mxu0  ;;  %v3640_v19 = vpack.c.bf16 %v1720_v7, %v1720_v7 }
 0x353   : > { %4372 = vpow2.f32 %v1572_v12  ;;  %2685 = vst [vmem:[%s5190_s17 + $0x80] sm:$0xf] %v3582_v13  ;;  %v1534_v20 = vmul.f32 0.5, %v1502_v14  ;;  %v3614_v61 = vpack.c.bf16 %v1502_v14, %v1502_v14  ;;  %v5269_v1 = vadd.f32 %v5178_v46, %v1339_v18 }
 0x354   : > { %v4367_v21 = vpop.eup %4366  ;;  %v1341_v15 = vpop.f32.mrf.mxu0  ;;  %v1721_v22 = vadd.f32 %v1689_v16, %v5210_v52  ;;  %2983 = vst [vmem:[%s5190_s17 + $0x28] sm:$0xf] %v3640_v19  ;;  %v3722_v12 = vunpack.c.l.bf16 %v5304_v3 }
 0x355   : > { %v1574_v25 = vmul.f32 1.442695, %v1534_v20  ;;  %2845 = vst [vmem:[%s5190_s17 + $0x84] sm:$0xf] %v3614_v61  ;;  %v3583_v26 = vpack.c.bf16 %v5269_v1, %v5269_v1  ;;  %v1503_v28 = vadd.f32 %v5182_v49, %v1341_v15  ;;  %v1690_v29 = vmul.f32 %v4367_v21, %v3714_v11  ;;  %v4346_v61 = vld [vmem:[#allocation13 + $0x18] sm:$0xff]  }
 0x356   : > { %v1345_v31 = vpop.f32.mrf.mxu0  ;;  %v1751_v27 = vpack.c.bf16 %v1721_v22, %v1720_v7  ;;  %v3641_v32 = vpack.c.bf16 %v1721_v22, %v1721_v22 }
 0x357   : > { %4374 = vpow2.f32 %v1574_v25  ;;  %2686 = vst [vmem:[%s5190_s17 + $0x90] sm:$0xf] %v3583_v26  ;;  %v1535_v52 = vmul.f32 0.5, %v1503_v28  ;;  %v3615_v34 = vpack.c.bf16 %v1503_v28, %v1503_v28  ;;  %v5282_v35 = vadd.f32 %v5178_v46, %v1345_v31 }
 0x358   : > { %v4369_v38 = vpop.eup %4368  ;;  %4016 = vmatmul.mubr.bf16.vlgmr.msra.gmra.mxu1 %v1751_v27  ;;  %2984 = vst [vmem:[%s5190_s17 + $0x38] sm:$0xf] %v3641_v32  ;;  %v1347_v39 = vpop.f32.mrf.mxu0  ;;  %v1722_v40 = vadd.f32 %v1690_v29, %v5219_v17  ;;  %v3723_v26 = vunpack.c.h.bf16 %v5304_v3  ;;  %v3772_v27 = vld [vmem:[%s5033_s25 + $0x28] sm:$0xff]   ;;  %v3773_v3 = vld [vmem:[%s5033_s25 + $0x30] sm:$0xff]  }
 0x359   : > { %v1576_v42 = vmul.f32 1.442695, %v1535_v52  ;;  %2846 = vst [vmem:[%s5190_s17 + $0x94] sm:$0xf] %v3615_v34  ;;  %v3584_v44 = vpack.c.bf16 %v5282_v35, %v5282_v35  ;;  %v1504_v48 = vadd.f32 %v5182_v49, %v1347_v39  ;;  %v1691_v53 = vmul.f32 %v4369_v38, %v3715_v23  ;;  %4048 = vmatpush3.bf16.msra.mxu1 %v5238_v37 }
 0x35a   : > { %v1349_v54 = vpop.f32.mrf.mxu0  ;;  %v3642_v55 = vpack.c.bf16 %v1722_v40, %v1722_v40  ;;  %4049 = vmatprep.subr.bf16.mxu1 %v4343_v33  ;;  %v3719_v37 = vunpack.c.h.bf16 %v5278_v30 }
 0x35b   : > { %4376 = vpow2.f32 %v1576_v42  ;;  %2687 = vst [vmem:[%s5190_s17 + $0xa0] sm:$0xf] %v3584_v44  ;;  %v1536_v17 = vmul.f32 0.5, %v1504_v48  ;;  %v3616_v51 = vpack.c.bf16 %v1504_v48, %v1504_v48  ;;  %v5294_v58 = vadd.f32 %v5178_v46, %v1349_v54 }
 0x35c   : > { %v4371_v59 = vpop.eup %4370  ;;  %v1351_v57 = vpop.f32.mrf.mxu0  ;;  %v1723_v60 = vadd.f32 %v1691_v53, %v5227_v24  ;;  %2985 = vst [vmem:[%s5190_s17 + $0x48] sm:$0xf] %v3642_v55  ;;  %v3726_v42 = vunpack.c.l.bf16 %v3772_v27 }
 0x35d   : > { %v1578_v62 = vmul.f32 1.442695, %v1536_v17  ;;  %2847 = vst [vmem:[%s5190_s17 + $0xa4] sm:$0xf] %v3616_v51  ;;  %v3585_v63 = vpack.c.bf16 %v5294_v58, %v5294_v58  ;;  %v1505_v0 = vadd.f32 %v5182_v49, %v1351_v57  ;;  %v1692_v2 = vmul.f32 %v4371_v59, %v3718_v41  ;;  %4050 = vmatpush3.bf16.msra.mxu1 %v4343_v33 }
 0x35e   : > { %v1355_v4 = vpop.f32.mrf.mxu0  ;;  %v1752_v5 = vpack.c.bf16 %v1723_v60, %v1722_v40  ;;  %v3643_v24 = vpack.c.bf16 %v1723_v60, %v1723_v60  ;;  %4051 = vmatprep.subr.bf16.mxu1 %v4344_v50 }
 0x35f   : > { %4378 = vpow2.f32 %v1578_v62  ;;  %2688 = vst [vmem:[%s5190_s17 + $0xb0] sm:$0xf] %v3585_v63  ;;  %v1537_v8 = vmul.f32 0.5, %v1505_v0  ;;  %v3617_v56 = vpack.c.bf16 %v1505_v0, %v1505_v0  ;;  %v5308_v9 = vadd.f32 %v5178_v46, %v1355_v4 }
 0x360   : > { %v4373_v10 = vpop.eup %4372  ;;  %4019 = vmatprep.mubr.bf16.mxu1 %v1752_v5  ;;  %2986 = vst [vmem:[%s5190_s17 + $0x58] sm:$0xf] %v3643_v24  ;;  %v1357_v7 = vpop.f32.mrf.mxu0  ;;  %v1724_v11 = vadd.f32 %v1692_v2, %v5236_v36 }
 0x361   : > { %v1580_v13 = vmul.f32 1.442695, %v1537_v8  ;;  %2848 = vst [vmem:[%s5190_s17 + $0xb4] sm:$0xf] %v3617_v56  ;;  %v3586_v14 = vpack.c.bf16 %v5308_v9, %v5308_v9  ;;  %v1506_v16 = vadd.f32 %v5182_v49, %v1357_v7  ;;  %v1693_v18 = vmul.f32 %v4373_v10, %v3719_v37  ;;  %4052 = vmatpush3.bf16.msra.mxu1 %v4344_v50 }
 0x362   : > { %v1359_v19 = vpop.f32.mrf.mxu0  ;;  %v3644_v20 = vpack.c.bf16 %v1724_v11, %v1724_v11  ;;  %4053 = vmatprep.subr.bf16.mxu1 %v4345_v6  ;;  %v3727_v37 = vunpack.c.h.bf16 %v3772_v27 }
 0x363   : > { %4380 = vpow2.f32 %v1580_v13  ;;  %2689 = vst [vmem:[%s5190_s17 + $0xc0] sm:$0xf] %v3586_v14  ;;  %v1538_v36 = vmul.f32 0.5, %v1506_v16  ;;  %v3618_v21 = vpack.c.bf16 %v1506_v16, %v1506_v16  ;;  %v5319_v15 = vadd.f32 %v5178_v46, %v1359_v19 }
 0x364   : > { %v4375_v22 = vpop.eup %4374  ;;  %v1361_v23 = vpop.f32.mrf.mxu0  ;;  %v1725_v25 = vadd.f32 %v1693_v18, %v5248_v45  ;;  %2987 = vst [vmem:[%s5190_s17 + $0x68] sm:$0xf] %v3644_v20 }
 0x365   : > { %v1582_v28 = vmul.f32 1.442695, %v1538_v36  ;;  %2849 = vst [vmem:[%s5190_s17 + $0xc4] sm:$0xf] %v3618_v21  ;;  %v3587_v29 = vpack.c.bf16 %v5319_v15, %v5319_v15  ;;  %v1507_v30 = vadd.f32 %v5182_v49, %v1361_v23  ;;  %v1694_v31 = vmul.f32 %v4375_v22, %v3722_v12  ;;  %4054 = vmatpush3.bf16.msra.mxu1 %v4345_v6 }
 0x366   : > { %v1365_v32 = vpop.f32.mrf.mxu0  ;;  %v1753_v33 = vpack.c.bf16 %v1725_v25, %v1724_v11  ;;  %v3645_v52 = vpack.c.bf16 %v1725_v25, %v1725_v25  ;;  %4055 = vmatprep.subr.bf16.mxu1 %v4346_v61  ;;  %v3730_v11 = vunpack.c.l.bf16 %v3773_v3  ;;  %v3731_v23 = vunpack.c.h.bf16 %v3773_v3 }
 0x367   : > { %4382 = vpow2.f32 %v1582_v28  ;;  %2690 = vst [vmem:[%s5190_s17 + $0xd0] sm:$0xf] %v3587_v29  ;;  %v1539_v45 = vmul.f32 0.5, %v1507_v30  ;;  %v3619_v34 = vpack.c.bf16 %v1507_v30, %v1507_v30  ;;  %v5331_v38 = vadd.f32 %v5178_v46, %v1365_v32  ;;  %v3774_v30 = vld [vmem:[%s5033_s25 + $0x38] sm:$0xff]  }
 0x368   : > { %v4377_v39 = vpop.eup %4376  ;;  %4020 = vmatmul.mubr.bf16.gmra.mxu1 %v1753_v33  ;;  %2988 = vst [vmem:[%s5190_s17 + $0x78] sm:$0xf] %v3645_v52  ;;  %v1367_v40 = vpop.f32.mrf.mxu0  ;;  %v1726_v41 = vadd.f32 %v1694_v31, %v5259_v47 }
 0x369   : > { %v1584_v44 = vmul.f32 1.442695, %v1539_v45  ;;  %2850 = vst [vmem:[%s5190_s17 + $0xd4] sm:$0xf] %v3619_v34  ;;  %v3588_v48 = vpack.c.bf16 %v5331_v38, %v5331_v38  ;;  %v1508_v53 = vadd.f32 %v5182_v49, %v1367_v40  ;;  %v1695_v54 = vmul.f32 %v4377_v39, %v3723_v26  ;;  %4056 = vmatpush3.bf16.msra.mxu1 %v4346_v61 }
 0x36a   : > { %v1369_v55 = vpop.f32.mrf.mxu0  ;;  %v3646_v50 = vpack.c.bf16 %v1726_v41, %v1726_v41  ;;  %v3734_v40 = vunpack.c.l.bf16 %v3774_v30 }
 0x36b   : > { %4384 = vpow2.f32 %v1584_v44  ;;  %2691 = vst [vmem:[%s5190_s17 + $0xe0] sm:$0xf] %v3588_v48  ;;  %v1540_v17 = vmul.f32 0.5, %v1508_v53  ;;  %v3620_v51 = vpack.c.bf16 %v1508_v53, %v1508_v53  ;;  %v5341_v47 = vadd.f32 %v5178_v46, %v1369_v55 }
 0x36c   : > { %v4379_v59 = vpop.eup %4378  ;;  %v1371_v57 = vpop.f32.mrf.mxu0  ;;  %v1727_v60 = vadd.f32 %v1695_v54, %v5269_v1  ;;  %2989 = vst [vmem:[%s5190_s17 + $0x88] sm:$0xf] %v3646_v50 }
 0x36d   : > { %v1586_v62 = vmul.f32 1.442695, %v1540_v17  ;;  %2851 = vst [vmem:[%s5190_s17 + $0xe4] sm:$0xf] %v3620_v51  ;;  %v3589_v63 = vpack.c.bf16 %v5341_v47, %v5341_v47  ;;  %v1509_v0 = vadd.f32 %v5182_v49, %v1371_v57  ;;  %v1696_v2 = vmul.f32 %v4379_v59, %v3726_v42 }
 0x36e   : > { %v1375_v4 = vpop.f32.mrf.mxu0  ;;  %v1754_v5 = vpack.c.bf16 %v1727_v60, %v1726_v41  ;;  %v3647_v24 = vpack.c.bf16 %v1727_v60, %v1727_v60  ;;  %v3735_v57 = vunpack.c.h.bf16 %v3774_v30 }
 0x36f   : > { %4386 = vpow2.f32 %v1586_v62  ;;  %2692 = vst [vmem:[%s5190_s17 + $0xf0] sm:$0xf] %v3589_v63  ;;  %v1541_v6 = vmul.f32 0.5, %v1509_v0  ;;  %v3621_v1 = vpack.c.bf16 %v1509_v0, %v1509_v0  ;;  %v5352_v8 = vadd.f32 %v5178_v46, %v1375_v4  ;;  %v3775_v0 = vld [vmem:[%s5033_s25 + $0x40] sm:$0xff]  }
 0x370   : > { %v4381_v56 = vpop.eup %4380  ;;  %4023 = vmatprep.mubr.bf16.mxu1 %v1754_v5  ;;  %2990 = vst [vmem:[%s5190_s17 + $0x98] sm:$0xf] %v3647_v24  ;;  %v1377_v10 = vpop.f32.mrf.mxu0  ;;  %v1728_v7 = vadd.f32 %v1696_v2, %v5282_v35 }
 0x371   : > { %v1588_v12 = vmul.f32 1.442695, %v1541_v6  ;;  %2852 = vst [vmem:[%s5190_s17 + $0xf4] sm:$0xf] %v3621_v1  ;;  %v3590_v13 = vpack.c.bf16 %v5352_v8, %v5352_v8  ;;  %v1510_v14 = vadd.f32 %v5182_v49, %v1377_v10  ;;  %v1697_v16 = vmul.f32 %v4381_v56, %v3727_v37 }
 0x372   : > { %v1379_v18 = vpop.f32.mrf.mxu0  ;;  %v3648_v19 = vpack.c.bf16 %v1728_v7, %v1728_v7  ;;  %v3738_v10 = vunpack.c.l.bf16 %v3775_v0 }
 0x373   : > { %4388 = vpow2.f32 %v1588_v12  ;;  %2693 = vst [vmem:[%s5190_s17 + $0x100] sm:$0xf] %v3590_v13  ;;  %v1542_v20 = vmul.f32 0.5, %v1510_v14  ;;  %v3622_v61 = vpack.c.bf16 %v1510_v14, %v1510_v14  ;;  %v5362_v35 = vadd.f32 %v5178_v46, %v1379_v18 }
 0x374   : > { %v4383_v36 = vpop.eup %4382  ;;  %v1381_v21 = vpop.f32.mrf.mxu0  ;;  %v1729_v22 = vadd.f32 %v1697_v16, %v5294_v58  ;;  %2991 = vst [vmem:[%s5190_s17 + $0xa8] sm:$0xf] %v3648_v19 }
 0x375   : > { %v1590_v25 = vmul.f32 1.442695, %v1542_v20  ;;  %2853 = vst [vmem:[%s5190_s17 + $0x104] sm:$0xf] %v3622_v61  ;;  %v3591_v26 = vpack.c.bf16 %v5362_v35, %v5362_v35  ;;  %v1511_v28 = vadd.f32 %v5182_v49, %v1381_v21  ;;  %v1698_v29 = vmul.f32 %v4383_v36, %v3730_v11 }
 0x376   : > { %v1385_v31 = vpop.f32.mrf.mxu0  ;;  %v1755_v27 = vpack.c.bf16 %v1729_v22, %v1728_v7  ;;  %v3649_v32 = vpack.c.bf16 %v1729_v22, %v1729_v22  ;;  %v3739_v21 = vunpack.c.h.bf16 %v3775_v0 }
 0x377   : > { %4390 = vpow2.f32 %v1590_v25  ;;  %2694 = vst [vmem:[%s5190_s17 + $0x110] sm:$0xf] %v3591_v26  ;;  %v1543_v33 = vmul.f32 0.5, %v1511_v28  ;;  %v3623_v58 = vpack.c.bf16 %v1511_v28, %v1511_v28  ;;  %v5373_v52 = vadd.f32 %v5178_v46, %v1385_v31  ;;  %v3776_v28 = vld [vmem:[%s5033_s25 + $0x48] sm:$0xff]  }
 0x378   : > { %v4385_v45 = vpop.eup %4384  ;;  %4024 = vmatmul.mubr.bf16.gmra.mxu1 %v1755_v27  ;;  %2992 = vst [vmem:[%s5190_s17 + $0xb8] sm:$0xf] %v3649_v32  ;;  %v1387_v34 = vpop.f32.mrf.mxu0  ;;  %v1730_v39 = vadd.f32 %v1698_v29, %v5308_v9 }
 0x379   : > { %v1592_v41 = vmul.f32 1.442695, %v1543_v33  ;;  %2854 = vst [vmem:[%s5190_s17 + $0x114] sm:$0xf] %v3623_v58  ;;  %v3592_v42 = vpack.c.bf16 %v5373_v52, %v5373_v52  ;;  %v1512_v44 = vadd.f32 %v5182_v49, %v1387_v34  ;;  %v1699_v48 = vmul.f32 %v4385_v45, %v3731_v23 }
 0x37a   : > { %v1389_v53 = vpop.f32.mrf.mxu0  ;;  %v3650_v54 = vpack.c.bf16 %v1730_v39, %v1730_v39  ;;  %v3742_v34 = vunpack.c.l.bf16 %v3776_v28 }
 0x37b   : > { %4392 = vpow2.f32 %v1592_v41  ;;  %2695 = vst [vmem:[%s5190_s17 + $0x120] sm:$0xf] %v3592_v42  ;;  %v1544_v55 = vmul.f32 0.5, %v1512_v44  ;;  %v3624_v50 = vpack.c.bf16 %v1512_v44, %v1512_v44  ;;  %v5383_v9 = vadd.f32 %v5178_v46, %v1389_v53 }
 0x37c   : > { %v4387_v17 = vpop.eup %4386  ;;  %v1391_v51 = vpop.f32.mrf.mxu0  ;;  %v1731_v59 = vadd.f32 %v1699_v48, %v5319_v15  ;;  %2993 = vst [vmem:[%s5190_s17 + $0xc8] sm:$0xf] %v3650_v54 }
 0x37d   : > { %v1594_v60 = vmul.f32 1.442695, %v1544_v55  ;;  %2855 = vst [vmem:[%s5190_s17 + $0x124] sm:$0xf] %v3624_v50  ;;  %v3593_v37 = vpack.c.bf16 %v5383_v9, %v5383_v9  ;;  %v1513_v62 = vadd.f32 %v5182_v49, %v1391_v51  ;;  %v1700_v63 = vmul.f32 %v4387_v17, %v3734_v40 }
 0x37e   : > { %v1395_v2 = vpop.f32.mrf.mxu0  ;;  %v1756_v3 = vpack.c.bf16 %v1731_v59, %v1730_v39  ;;  %v3651_v4 = vpack.c.bf16 %v1731_v59, %v1731_v59  ;;  %v3743_v51 = vunpack.c.h.bf16 %v3776_v28 }
 0x37f   : > { %4394 = vpow2.f32 %v1594_v60  ;;  %2696 = vst [vmem:[%s5190_s17 + $0x130] sm:$0xf] %v3593_v37  ;;  %v1545_v5 = vmul.f32 0.5, %v1513_v62  ;;  %v3625_v15 = vpack.c.bf16 %v1513_v62, %v1513_v62  ;;  %v5394_v24 = vadd.f32 %v5178_v46, %v1395_v2  ;;  %v3777_v62 = vld [vmem:[%s5033_s25 + $0x50] sm:$0xff]  }
 0x380   : > { %v4389_v6 = vpop.eup %4388  ;;  %4027 = vmatprep.mubr.bf16.mxu1 %v1756_v3  ;;  %2994 = vst [vmem:[%s5190_s17 + $0xd8] sm:$0xf] %v3651_v4  ;;  %v1397_v1 = vpop.f32.mrf.mxu0  ;;  %v1732_v56 = vadd.f32 %v1700_v63, %v5331_v38 }
 0x381   : > { %v1596_v7 = vmul.f32 1.442695, %v1545_v5  ;;  %2856 = vst [vmem:[%s5190_s17 + $0x134] sm:$0xf] %v3625_v15  ;;  %v3594_v11 = vpack.c.bf16 %v5394_v24, %v5394_v24  ;;  %v1514_v12 = vadd.f32 %v5182_v49, %v1397_v1  ;;  %v1701_v13 = vmul.f32 %v4389_v6, %v3735_v57 }
 0x382   : > { %v1399_v14 = vpop.f32.mrf.mxu0  ;;  %v3652_v16 = vpack.c.bf16 %v1732_v56, %v1732_v56  ;;  %v3746_v1 = vunpack.c.l.bf16 %v3777_v62 }
 0x383   : > { %4396 = vpow2.f32 %v1596_v7  ;;  %2697 = vst [vmem:[%s5190_s17 + $0x140] sm:$0xf] %v3594_v11  ;;  %v1546_v18 = vmul.f32 0.5, %v1514_v12  ;;  %v3626_v19 = vpack.c.bf16 %v1514_v12, %v1514_v12  ;;  %v5404_v38 = vadd.f32 %v5178_v46, %v1399_v14 }
 0x384   : > { %v4391_v20 = vpop.eup %4390  ;;  %v1401_v61 = vpop.f32.mrf.mxu0  ;;  %v1733_v36 = vadd.f32 %v1701_v13, %v5341_v47  ;;  %2995 = vst [vmem:[%s5190_s17 + $0xe8] sm:$0xf] %v3652_v16 }
 0x385   : > { %v1598_v22 = vmul.f32 1.442695, %v1546_v18  ;;  %2857 = vst [vmem:[%s5190_s17 + $0x144] sm:$0xf] %v3626_v19  ;;  %v3595_v23 = vpack.c.bf16 %v5404_v38, %v5404_v38  ;;  %v1515_v25 = vadd.f32 %v5182_v49, %v1401_v61  ;;  %v1702_v26 = vmul.f32 %v4391_v20, %v3738_v10 }
 0x386   : > { %v1405_v29 = vpop.f32.mrf.mxu0  ;;  %v1757_v30 = vpack.c.bf16 %v1733_v36, %v1732_v56  ;;  %v3653_v31 = vpack.c.bf16 %v1733_v36, %v1733_v36  ;;  %v3747_v61 = vunpack.c.h.bf16 %v3777_v62  ;;  %v3779_v62 = vld [vmem:[%s5033_s25 + $0x60] sm:$0xff]  }
 0x387   : > { %4398 = vpow2.f32 %v1598_v22  ;;  %2698 = vst [vmem:[%s5190_s17 + $0x150] sm:$0xf] %v3595_v23  ;;  %v1547_v27 = vmul.f32 0.5, %v1515_v25  ;;  %v3627_v47 = vpack.c.bf16 %v1515_v25, %v1515_v25  ;;  %v5415_v32 = vadd.f32 %v5178_v46, %v1405_v29  ;;  %v5455_v25 = vld [vmem:[%s5033_s25 + $0x58] sm:$0xff]  }
 0x388   : > { %v4393_v33 = vpop.eup %4392  ;;  %4028 = vmatmul.mubr.bf16.gmra.mxu1 %v1757_v30  ;;  %2996 = vst [vmem:[%s5190_s17 + $0xf8] sm:$0xf] %v3653_v31  ;;  %v1407_v58 = vpop.f32.mrf.mxu0  ;;  %v1734_v45 = vadd.f32 %v1702_v26, %v5352_v8 }
 0x389   : > { %v1600_v39 = vmul.f32 1.442695, %v1547_v27  ;;  %2858 = vst [vmem:[%s5190_s17 + $0x154] sm:$0xf] %v3627_v47  ;;  %v3596_v40 = vpack.c.bf16 %v5415_v32, %v5415_v32  ;;  %v1516_v41 = vadd.f32 %v5182_v49, %v1407_v58  ;;  %v1703_v42 = vmul.f32 %v4393_v33, %v3739_v21 }
 0x38a   : > { %v1409_v44 = vpop.f32.mrf.mxu0  ;;  %v3654_v48 = vpack.c.bf16 %v1734_v45, %v1734_v45  ;;  %v3750_v58 = vunpack.c.l.bf16 %v5455_v25 }
 0x38b   : > { %4400 = vpow2.f32 %v1600_v39  ;;  %2699 = vst [vmem:[%s5190_s17 + $0x160] sm:$0xf] %v3596_v40  ;;  %v1548_v53 = vmul.f32 0.5, %v1516_v41  ;;  %v3628_v54 = vpack.c.bf16 %v1516_v41, %v1516_v41  ;;  %v5425_v8 = vadd.f32 %v5178_v46, %v1409_v44 }
 0x38c   : > { %v4395_v55 = vpop.eup %4394  ;;  %v1411_v50 = vpop.f32.mrf.mxu0  ;;  %v1735_v17 = vadd.f32 %v1703_v42, %v5362_v35  ;;  %2997 = vst [vmem:[%s5190_s17 + $0x108] sm:$0xf] %v3654_v48 }
 0x38d   : > { %v1602_v59 = vmul.f32 1.442695, %v1548_v53  ;;  %2859 = vst [vmem:[%s5190_s17 + $0x164] sm:$0xf] %v3628_v54  ;;  %v3597_v57 = vpack.c.bf16 %v5425_v8, %v5425_v8  ;;  %v1517_v60 = vadd.f32 %v5182_v49, %v1411_v50  ;;  %v1704_v37 = vmul.f32 %v4395_v55, %v3742_v34 }
 0x38e   : > { %v1415_v63 = vpop.f32.mrf.mxu0  ;;  %v1758_v0 = vpack.c.bf16 %v1735_v17, %v1734_v45  ;;  %v3655_v2 = vpack.c.bf16 %v1735_v17, %v1735_v17  ;;  %v4347_v45 = vld [vmem:[#allocation13 + $0x10] sm:$0xff]   ;;  %v3751_v17 = vunpack.c.h.bf16 %v5455_v25 }
 0x38f   : > { %4402 = vpow2.f32 %v1602_v59  ;;  %2700 = vst [vmem:[%s5190_s17 + $0x170] sm:$0xf] %v3597_v57  ;;  %v1549_v3 = vmul.f32 0.5, %v1517_v60  ;;  %v3629_v35 = vpack.c.bf16 %v1517_v60, %v1517_v60  ;;  %v5436_v4 = vadd.f32 %v5178_v46, %v1415_v63  ;;  %4057 = vmatprep.subr.bf16.mxu1 %v4347_v45 }
 0x390   : > { %v4397_v5 = vpop.eup %4396  ;;  %4031 = vmatprep.mubr.bf16.mxu1 %v1758_v0  ;;  %2998 = vst [vmem:[%s5190_s17 + $0x118] sm:$0xf] %v3655_v2  ;;  %v1417_v15 = vpop.f32.mrf.mxu0  ;;  %v1736_v6 = vadd.f32 %v1704_v37, %v5373_v52  ;;  %4058 = vmatpush3.bf16.msra.mxu1 %v4347_v45 }
 0x391   : > { %v1604_v56 = vmul.f32 1.442695, %v1549_v3  ;;  %2860 = vst [vmem:[%s5190_s17 + $0x174] sm:$0xf] %v3629_v35  ;;  %v3598_v10 = vpack.c.bf16 %v5436_v4, %v5436_v4  ;;  %v1518_v7 = vadd.f32 %v5182_v49, %v1417_v15  ;;  %v1705_v11 = vmul.f32 %v4397_v5, %v3743_v51  ;;  %v4348_v51 = vld [vmem:[#allocation13 + $0x8] sm:$0xff]  }
 0x392   : > { %v1419_v12 = vpop.f32.mrf.mxu0  ;;  %v3656_v13 = vpack.c.bf16 %v1736_v6, %v1736_v6  ;;  %4059 = vmatprep.subr.bf16.mxu1 %v4348_v51 }
 0x393   : > { %4404 = vpow2.f32 %v1604_v56  ;;  %2701 = vst [vmem:[%s5190_s17 + $0x180] sm:$0xf] %v3598_v10  ;;  %v1550_v14 = vmul.f32 0.5, %v1518_v7  ;;  %v3630_v16 = vpack.c.bf16 %v1518_v7, %v1518_v7  ;;  %v5446_v52 = vadd.f32 %v5178_v46, %v1419_v12  ;;  %v4349_v56 = vld [vmem:[#allocation13] sm:$0xff]  }
 0x394   : > { %v4399_v18 = vpop.eup %4398  ;;  %v1421_v19 = vpop.f32.mrf.mxu0  ;;  %v1737_v20 = vadd.f32 %v1705_v11, %v5383_v9  ;;  %2999 = vst [vmem:[%s5190_s17 + $0x128] sm:$0xf] %v3656_v13  ;;  %4060 = vmatpush3.bf16.msra.mxu1 %v4348_v51 }
 0x395   : > { %v1606_v36 = vmul.f32 1.442695, %v1550_v14  ;;  %2861 = vst [vmem:[%s5190_s17 + $0x184] sm:$0xf] %v3630_v16  ;;  %v3599_v21 = vpack.c.bf16 %v5446_v52, %v5446_v52  ;;  %v1519_v22 = vadd.f32 %v5182_v49, %v1421_v19  ;;  %v1706_v23 = vmul.f32 %v4399_v18, %v3746_v1  ;;  %4061 = vmatprep.subr.bf16.mxu1 %v4349_v56 }
 0x396   : > { %v1425_v26 = vpop.f32.mrf.mxu0  ;;  %v1759_v28 = vpack.c.bf16 %v1737_v20, %v1736_v6  ;;  %v3657_v29 = vpack.c.bf16 %v1737_v20, %v1737_v20  ;;  %v3754_v1 = vunpack.c.l.bf16 %v3779_v62 }
 0x397   : > { %4406 = vpow2.f32 %v1606_v36  ;;  %2702 = vst [vmem:[%s5190_s17 + $0x190] sm:$0xf] %v3599_v21  ;;  %v1551_v9 = vmul.f32 0.5, %v1519_v22  ;;  %v3631_v30 = vpack.c.bf16 %v1519_v22, %v1519_v22  ;;  %v5459_v31 = vadd.f32 %v5178_v46, %v1425_v26  ;;  %v3780_v26 = vld [vmem:[%s5033_s25 + $0x68] sm:$0xff]  }
 0x398   : > { %v4401_v27 = vpop.eup %4400  ;;  %4032 = vmatmul.mubr.bf16.gmra.mxu1 %v1759_v28  ;;  %3000 = vst [vmem:[%s5190_s17 + $0x138] sm:$0xf] %v3657_v29  ;;  %v1427_v47 = vpop.f32.mrf.mxu0  ;;  %v1738_v33 = vadd.f32 %v1706_v23, %v5394_v24  ;;  %v3755_v36 = vunpack.c.h.bf16 %v3779_v62  ;;  %v3758_v45 = vunpack.c.l.bf16 %v3780_v26 }
 0x399   : > { %v1608_v34 = vmul.f32 1.442695, %v1551_v9  ;;  %2862 = vst [vmem:[%s5190_s17 + $0x194] sm:$0xf] %v3631_v30  ;;  %v3600_v39 = vpack.c.bf16 %v5459_v31, %v5459_v31  ;;  %v1520_v40 = vadd.f32 %v5182_v49, %v1427_v47  ;;  %v1707_v41 = vmul.f32 %v4401_v27, %v3747_v61  ;;  %4062 = vmatpush3.bf16.msra.mxu1 %v4349_v56 }
 0x39a   : > { %v1429_v42 = vpop.f32.mrf.mxu0  ;;  %v3658_v44 = vpack.c.bf16 %v1738_v33, %v1738_v33 }
 0x39b   : > { %4408 = vpow2.f32 %v1608_v34  ;;  %2703 = vst [vmem:[%s5190_s17 + $0x1a0] sm:$0xf] %v3600_v39  ;;  %v1552_v24 = vmul.f32 0.5, %v1520_v40  ;;  %v3632_v48 = vpack.c.bf16 %v1520_v40, %v1520_v40  ;;  %v5470_v53 = vadd.f32 %v5178_v46, %v1429_v42 }
 0x39c   : > { %v4403_v54 = vpop.eup %4402  ;;  %v1431_v55 = vpop.f32.mrf.mxu0  ;;  %v1739_v50 = vadd.f32 %v1707_v41, %v5404_v38  ;;  %3001 = vst [vmem:[%s5190_s17 + $0x148] sm:$0xf] %v3658_v44 }
 0x39d   : > { %v1610_v59 = vmul.f32 1.442695, %v1552_v24  ;;  %2863 = vst [vmem:[%s5190_s17 + $0x1a4] sm:$0xf] %v3632_v48  ;;  %v3601_v57 = vpack.c.bf16 %v5470_v53, %v5470_v53  ;;  %v1521_v60 = vadd.f32 %v5182_v49, %v1431_v55  ;;  %v1708_v37 = vmul.f32 %v4403_v54, %v3750_v58 }
 0x39e   : > { %v1435_v63 = vpop.f32.mrf.mxu0  ;;  %v1760_v0 = vpack.c.bf16 %v1739_v50, %v1738_v33  ;;  %v3659_v2 = vpack.c.bf16 %v1739_v50, %v1739_v50 }
 0x39f   : > { %4410 = vpow2.f32 %v1610_v59  ;;  %2704 = vst [vmem:[%s5190_s17 + $0x1b0] sm:$0xf] %v3601_v57  ;;  %v1553_v38 = vmul.f32 0.5, %v1521_v60  ;;  %v3633_v3 = vpack.c.bf16 %v1521_v60, %v1521_v60  ;;  %v5482_v35 = vadd.f32 %v5178_v46, %v1435_v63  ;;  %v3781_v63 = vld [vmem:[%s5033_s25 + $0x70] sm:$0xff]  }
 0x3a0   : > { %v4405_v5 = vpop.eup %4404  ;;  %4035 = vmatprep.mubr.bf16.mxu1 %v1760_v0  ;;  %3002 = vst [vmem:[%s5190_s17 + $0x158] sm:$0xf] %v3659_v2  ;;  %v1437_v15 = vpop.f32.mrf.mxu0  ;;  %v1740_v6 = vadd.f32 %v1708_v37, %v5415_v32 }
 0x3a1   : > { %v1612_v10 = vmul.f32 1.442695, %v1553_v38  ;;  %2864 = vst [vmem:[%s5190_s17 + $0x1b4] sm:$0xf] %v3633_v3  ;;  %v3602_v7 = vpack.c.bf16 %v5482_v35, %v5482_v35  ;;  %v1522_v11 = vadd.f32 %v5182_v49, %v1437_v15  ;;  %v1709_v12 = vmul.f32 %v4405_v5, %v3751_v17 }
 0x3a2   : > { %v1439_v13 = vpop.f32.mrf.mxu0  ;;  %v3660_v14 = vpack.c.bf16 %v1740_v6, %v1740_v6  ;;  %v3759_v17 = vunpack.c.h.bf16 %v3780_v26  ;;  %v3762_v5 = vunpack.c.l.bf16 %v3781_v63 }
 0x3a3   : > { %4412 = vpow2.f32 %v1612_v10  ;;  %2705 = vst [vmem:[%s5190_s17 + $0x1c0] sm:$0xf] %v3602_v7  ;;  %v1554_v16 = vmul.f32 0.5, %v1522_v11  ;;  %v3634_v32 = vpack.c.bf16 %v1522_v11, %v1522_v11  ;;  %v5492_v18 = vadd.f32 %v5178_v46, %v1439_v13  ;;  %v3782_v7 = vld [vmem:[%s5033_s25 + $0x78] sm:$0xff]  }
 0x3a4   : > { %v4407_v19 = vpop.eup %4406  ;;  %v1441_v20 = vpop.f32.mrf.mxu0  ;;  %v1741_v61 = vadd.f32 %v1709_v12, %v5425_v8  ;;  %3003 = vst [vmem:[%s5190_s17 + $0x168] sm:$0xf] %v3660_v14  ;;  %v3763_v10 = vunpack.c.h.bf16 %v3781_v63 }
 0x3a5   : > { %v1614_v21 = vmul.f32 1.442695, %v1554_v16  ;;  %2865 = vst [vmem:[%s5190_s17 + $0x1c4] sm:$0xf] %v3634_v32  ;;  %v3603_v22 = vpack.c.bf16 %v5492_v18, %v5492_v18  ;;  %v1523_v23 = vadd.f32 %v5182_v49, %v1441_v20  ;;  %v1710_v25 = vmul.f32 %v4407_v19, %v3754_v1 }
 0x3a6   : > { %v1445_v28 = vpop.f32.mrf.mxu0  ;;  %v1761_v29 = vpack.c.bf16 %v1741_v61, %v1740_v6  ;;  %v3661_v9 = vpack.c.bf16 %v1741_v61, %v1741_v61  ;;  %v3766_v16 = vunpack.c.l.bf16 %v3782_v7  ;;  %v3767_v61 = vunpack.c.h.bf16 %v3782_v7 }
 0x3a7   : > { %4414 = vpow2.f32 %v1614_v21  ;;  %2706 = vst [vmem:[%s5190_s17 + $0x1d0] sm:$0xf] %v3603_v22  ;;  %v1555_v30 = vmul.f32 0.5, %v1523_v23  ;;  %v3635_v8 = vpack.c.bf16 %v1523_v23, %v1523_v23  ;;  %v5503_v27 = vadd.f32 %v5178_v46, %v1445_v28 }
 0x3a8   : > { %v4409_v47 = vpop.eup %4408  ;;  %4036 = vmatmul.mubr.bf16.gmra.mxu1 %v1761_v29  ;;  %3004 = vst [vmem:[%s5190_s17 + $0x178] sm:$0xf] %v3661_v9  ;;  %v1447_v33 = vpop.f32.mrf.mxu0  ;;  %v1742_v58 = vadd.f32 %v1710_v25, %v5436_v4  ;;  %v4351_v29 = vld [vmem:[#allocation14 + $0x30] sm:$0xff]   ;;  %v1784_v9 = vsub.s32 4, %v5071_v43 }
 0x3a9   : > { %v1616_v34 = vmul.f32 1.442695, %v1555_v30  ;;  %2866 = vst [vmem:[%s5190_s17 + $0x1d4] sm:$0xf] %v3635_v8  ;;  %v3604_v39 = vpack.c.bf16 %v5503_v27, %v5503_v27  ;;  %v1524_v40 = vadd.f32 %v5182_v49, %v1447_v33  ;;  %v1711_v41 = vmul.f32 %v4409_v47, %v3755_v36  ;;  %v4352_v8 = vld [vmem:[#allocation14 + $0x28] sm:$0xff]  }
 0x3aa   : > { %v1449_v42 = vpop.f32.mrf.mxu0  ;;  %v3662_v44 = vpack.c.bf16 %v1742_v58, %v1742_v58 }
 0x3ab   : > { %4416 = vpow2.f32 %v1616_v34  ;;  %2707 = vst [vmem:[%s5190_s17 + $0x1e0] sm:$0xf] %v3604_v39  ;;  %v1556_v24 = vmul.f32 0.5, %v1524_v40  ;;  %v3636_v48 = vpack.c.bf16 %v1524_v40, %v1524_v40  ;;  %v1489_v4 = vadd.f32 %v5178_v46, %v1449_v42  ;;  %v4353_v39 = vld [vmem:[#allocation14 + $0x20] sm:$0xff]  }
 0x3ac   : > { %v4411_v54 = vpop.eup %4410  ;;  %v1451_v55 = vpop.f32.mrf.mxu0  ;;  %v1743_v50 = vadd.f32 %v1711_v41, %v5446_v52  ;;  %3005 = vst [vmem:[%s5190_s17 + $0x188] sm:$0xf] %v3662_v44 }
 0x3ad   : > { %v1618_v51 = vmul.f32 1.442695, %v1556_v24  ;;  %2867 = vst [vmem:[%s5190_s17 + $0x1e4] sm:$0xf] %v3636_v48  ;;  %v3605_v59 = vpack.c.bf16 %v1489_v4, %v1489_v4  ;;  %v1525_v57 = vadd.f32 %v5182_v49, %v1451_v55  ;;  %v1712_v60 = vmul.f32 %v4411_v54, %v3758_v45 }
 0x3ae   : > { %v1762_v37 = vpack.c.bf16 %v1743_v50, %v1742_v58  ;;  %v3663_v62 = vpack.c.bf16 %v1743_v50, %v1743_v50 }
 0x3af   : > { %4418 = vpow2.f32 %v1618_v51  ;;  %2708 = vst [vmem:[%s5190_s17 + $0x1f0] sm:$0xf] %v3605_v59  ;;  %v1557_v46 = vmul.f32 0.5, %v1525_v57  ;;  %v3637_v0 = vpack.c.bf16 %v1525_v57, %v1525_v57  ;;  %v1744_v52 = vadd.f32 %v1712_v60, %v5459_v31 }
 0x3b0   : > { %v4413_v2 = vpop.eup %4412  ;;  %4039 = vmatprep.mubr.bf16.mxu1 %v1762_v37  ;;  %3006 = vst [vmem:[%s5190_s17 + $0x198] sm:$0xf] %v3663_v62 }
 0x3b1   : > { %v1620_v38 = vmul.f32 1.442695, %v1557_v46  ;;  %2868 = vst [vmem:[%s5190_s17 + $0x1f4] sm:$0xf] %v3637_v0  ;;  %v1713_v3 = vmul.f32 %v4413_v2, %v3759_v17  ;;  %v3664_v49 = vpack.c.bf16 %v1744_v52, %v1744_v52 }
 0x3b3   : > { %4420 = vpow2.f32 %v1620_v38  ;;  %v1745_v15 = vadd.f32 %v1713_v3, %v5470_v53  ;;  %3007 = vst [vmem:[%s5190_s17 + $0x1a8] sm:$0xf] %v3664_v49 }
 0x3b4   : > { %v4415_v6 = vpop.eup %4414 }
 0x3b5   : > { %v1763_v1 = vpack.c.bf16 %v1745_v15, %v1744_v52  ;;  %v3665_v56 = vpack.c.bf16 %v1745_v15, %v1745_v15  ;;  %v1714_v31 = vmul.f32 %v4415_v6, %v3762_v5 }
 0x3b7   : > { %4040 = vmatmul.mubr.bf16.gmra.mxu1 %v1763_v1  ;;  %3008 = vst [vmem:[%s5190_s17 + $0x1b8] sm:$0xf] %v3665_v56  ;;  %v1746_v11 = vadd.f32 %v1714_v31, %v5482_v35 }
 0x3b8   : > { %v4417_v12 = vpop.eup %4416 }
 0x3b9   : > { %v1715_v13 = vmul.f32 %v4417_v12, %v3763_v10  ;;  %v3666_v14 = vpack.c.bf16 %v1746_v11, %v1746_v11 }
 0x3bb   : > { %v1747_v53 = vadd.f32 %v1715_v13, %v5492_v18  ;;  %3009 = vst [vmem:[%s5190_s17 + $0x1c8] sm:$0xf] %v3666_v14  ;;  %v4350_v18 = vld [vmem:[#allocation14 + $0x38] sm:$0xff]  }
 0x3bc   : > { %v4419_v32 = vpop.eup %4418  ;;  %4095 = vmatprep.subr.bf16.mxu0 %v4350_v18 }
 0x3bd   : > { %v1764_v19 = vpack.c.bf16 %v1747_v53, %v1746_v11  ;;  %v3667_v20 = vpack.c.bf16 %v1747_v53, %v1747_v53  ;;  %v1716_v36 = vmul.f32 %v4419_v32, %v3766_v16  ;;  %4096 = vmatpush3.bf16.msra.mxu0 %v4350_v18 }
 0x3be   : > { %4097 = vmatprep.subr.bf16.mxu0 %v4351_v29 }
 0x3bf   : > { %4043 = vmatprep.mubr.bf16.mxu1 %v1764_v19  ;;  %3010 = vst [vmem:[%s5190_s17 + $0x1d8] sm:$0xf] %v3667_v20  ;;  %v1748_v21 = vadd.f32 %v1716_v36, %v5503_v27  ;;  %v5537_v27 = vld [vmem:[%s5736_s8] sm:$0xff] }
 0x3c0   : > { %v4421_v22 = vpop.eup %4420  ;;  %v5540_v47 = vrot.slane %v5537_v27, %v1784_v9 }
 0x3c1   : > { %v1717_v35 = vmul.f32 %v4421_v22, %v3767_v61  ;;  %v3668_v23 = vpack.c.bf16 %v1748_v21, %v1748_v21  ;;  %4098 = vmatpush3.bf16.msra.mxu0 %v4351_v29 }
 0x3c2   : > { %4099 = vmatprep.subr.bf16.mxu0 %v4352_v8 }
 0x3c3   : > { %v1749_v25 = vadd.f32 %v1717_v35, %v1489_v4  ;;  %3011 = vst [vmem:[%s5190_s17 + $0x1e8] sm:$0xf] %v3668_v23  ;;  %v4354_v4 = vld [vmem:[#allocation14 + $0x18] sm:$0xff]  }
 0x3c5   : > { %v1765_v26 = vpack.c.bf16 %v1749_v25, %v1748_v21  ;;  %v3669_v28 = vpack.c.bf16 %v1749_v25, %v1749_v25  ;;  %4100 = vmatpush3.bf16.msra.mxu0 %v4352_v8 }
 0x3c6   : > { %4101 = vmatprep.subr.bf16.mxu0 %v4353_v39 }
 0x3c7   : > { %4044 = vmatmul.mubr.bf16.gmra.mxu1 %v1765_v26  ;;  %3012 = vst [vmem:[%s5190_s17 + $0x1f8] sm:$0xf] %v3669_v28 }
 0x3c9   : > { %4102 = vmatpush3.bf16.msra.mxu0 %v4353_v39 }
 0x3ca   : > { %4103 = vmatprep.subr.bf16.mxu0 %v4354_v4 }
 0x3cd   : > { %4104 = vmatpush3.bf16.msra.mxu0 %v4354_v4 }
 0x418   : > { %v4017_v30 = vpop.f32.mrf.mxu1 }
 0x419   : > { %v1877_v40 = vadd.f32 %v4017_v30, %v5540_v47 }
 0x41a   : > { %v1868_v33 = vpop.f32.mrf.mxu1 }
 0x41b   : > { %v1869_v45 = vadd.f32 %v1868_v33, %v5540_v47  ;;  %v1997_v54 = vmax.f32 %v1877_v40, 0.0 }
 0x41c   : > { %v4018_v58 = vpop.f32.mrf.mxu1 }
 0x41d   : > { %v1880_v34 = vadd.f32 %v4018_v58, %v5540_v47  ;;  %v1995_v24 = vmax.f32 %v1869_v45, 0.0 }
 0x41e   : > { %v1871_v41 = vpop.f32.mrf.mxu1 }
 0x41f   : > { %v1872_v42 = vadd.f32 %v1871_v41, %v5540_v47  ;;  %v1998_v44 = vmax.f32 %v1880_v34, 0.0 }
 0x421   : > { %v1996_v48 = vmax.f32 %v1872_v42, 0.0  ;;  %v2028_v50 = vpack.c.bf16 %v1998_v44, %v1997_v54 }
 0x423   : > { %v2027_v55 = vpack.c.bf16 %v1996_v48, %v1995_v24  ;;  %v4355_v48 = vld [vmem:[#allocation14 + $0x10] sm:$0xff]  }
 0x424   : > { %4105 = vmatprep.subr.bf16.mxu0 %v4355_v48 }
 0x425   : > { %4063 = vmatprep.mubr.bf16.mxu1 %v2027_v55  ;;  %4106 = vmatpush3.bf16.msra.mxu0 %v4355_v48  ;;  %v4356_v55 = vld [vmem:[#allocation14 + $0x8] sm:$0xff]  }
 0x426   : > { %4064 = vmatmul.mubr.bf16.vlgmr.msra.gmra.mxu1 %v2028_v50  ;;  %4107 = vmatprep.subr.bf16.mxu0 %v4356_v55 }
 0x428   : > { %v4021_v17 = vpop.f32.mrf.mxu1 }
 0x429   : > { %v1893_v37 = vadd.f32 %v4021_v17, %v5540_v47  ;;  %4108 = vmatpush3.bf16.msra.mxu0 %v4356_v55 }
 0x42a   : > { %v1884_v51 = vpop.f32.mrf.mxu1 }
 0x42b   : > { %v1885_v57 = vadd.f32 %v1884_v51, %v5540_v47  ;;  %v2001_v2 = vmax.f32 %v1893_v37, 0.0 }
 0x42c   : > { %v4022_v59 = vpop.f32.mrf.mxu1 }
 0x42d   : > { %v1896_v60 = vadd.f32 %v4022_v59, %v5540_v47  ;;  %v1999_v0 = vmax.f32 %v1885_v57, 0.0 }
 0x42e   : > { %v1887_v62 = vpop.f32.mrf.mxu1 }
 0x42f   : > { %v1888_v63 = vadd.f32 %v1887_v62, %v5540_v47  ;;  %v2002_v46 = vmax.f32 %v1896_v60, 0.0  ;;  %v4357_v60 = vld [vmem:[#allocation14] sm:$0xff]  }
 0x430   : > { %4109 = vmatprep.subr.bf16.mxu0 %v4357_v60 }
 0x431   : > { %v2000_v52 = vmax.f32 %v1888_v63, 0.0  ;;  %v2030_v3 = vpack.c.bf16 %v2002_v46, %v2001_v2  ;;  %4110 = vmatpush3.bf16.msra.mxu0 %v4357_v60 }
 0x433   : > { %v2029_v38 = vpack.c.bf16 %v2000_v52, %v1999_v0 }
 0x435   : > { %4067 = vmatprep.mubr.bf16.mxu1 %v2029_v38 }
 0x436   : > { %4068 = vmatmul.mubr.bf16.gmra.mxu1 %v2030_v3 }
 0x438   : > { %v4025_v49 = vpop.f32.mrf.mxu1 }
 0x439   : > { %v1909_v56 = vadd.f32 %v4025_v49, %v5540_v47 }
 0x43a   : > { %v1900_v5 = vpop.f32.mrf.mxu1 }
 0x43b   : > { %v1901_v6 = vadd.f32 %v1900_v5, %v5540_v47  ;;  %v2005_v13 = vmax.f32 %v1909_v56, 0.0 }
 0x43c   : > { %v4026_v15 = vpop.f32.mrf.mxu1 }
 0x43d   : > { %v1912_v1 = vadd.f32 %v4026_v15, %v5540_v47  ;;  %v2003_v11 = vmax.f32 %v1901_v6, 0.0 }
 0x43e   : > { %v1903_v10 = vpop.f32.mrf.mxu1 }
 0x43f   : > { %v1904_v31 = vadd.f32 %v1903_v10, %v5540_v47  ;;  %v2006_v7 = vmax.f32 %v1912_v1, 0.0 }
 0x441   : > { %v2004_v12 = vmax.f32 %v1904_v31, 0.0  ;;  %v2032_v16 = vpack.c.bf16 %v2006_v7, %v2005_v13 }
 0x443   : > { %v2031_v14 = vpack.c.bf16 %v2004_v12, %v2003_v11 }
 0x445   : > { %4071 = vmatprep.mubr.bf16.mxu1 %v2031_v14 }
 0x446   : > { %4072 = vmatmul.mubr.bf16.gmra.mxu1 %v2032_v16 }
 0x448   : > { %v4029_v53 = vpop.f32.mrf.mxu1 }
 0x449   : > { %v1925_v36 = vadd.f32 %v4029_v53, %v5540_v47 }
 0x44a   : > { %v1916_v32 = vpop.f32.mrf.mxu1 }
 0x44b   : > { %v1917_v20 = vadd.f32 %v1916_v32, %v5540_v47  ;;  %v2009_v26 = vmax.f32 %v1925_v36, 0.0 }
 0x44c   : > { %v4030_v19 = vpop.f32.mrf.mxu1 }
 0x44d   : > { %v1928_v61 = vadd.f32 %v4030_v19, %v5540_v47  ;;  %v2007_v23 = vmax.f32 %v1917_v20, 0.0 }
 0x44e   : > { %v1919_v21 = vpop.f32.mrf.mxu1 }
 0x44f   : > { %v1920_v22 = vadd.f32 %v1919_v21, %v5540_v47  ;;  %v2010_v35 = vmax.f32 %v1928_v61, 0.0 }
 0x451   : > { %v2008_v25 = vmax.f32 %v1920_v22, 0.0  ;;  %v2034_v18 = vpack.c.bf16 %v2010_v35, %v2009_v26 }
 0x453   : > { %v2033_v28 = vpack.c.bf16 %v2008_v25, %v2007_v23 }
 0x455   : > { %4075 = vmatprep.mubr.bf16.mxu1 %v2033_v28  ;;  %v2061_v28 = vsub.s32 5, %v5071_v43 }
 0x456   : > { %4076 = vmatmul.mubr.bf16.gmra.mxu1 %v2034_v18 }
 0x458   : > { %v4033_v29 = vpop.f32.mrf.mxu1 }
 0x459   : > { %v1941_v58 = vadd.f32 %v4033_v29, %v5540_v47  ;;  %v5576_v29 = vrot.slane %v5537_v27, %v2061_v28 }
 0x45a   : > { %v1932_v9 = vpop.f32.mrf.mxu1 }
 0x45b   : > { %v1933_v8 = vadd.f32 %v1932_v9, %v5540_v47  ;;  %v2013_v42 = vmax.f32 %v1941_v58, 0.0 }
 0x45c   : > { %v4034_v30 = vpop.f32.mrf.mxu1 }
 0x45d   : > { %v1944_v33 = vadd.f32 %v4034_v30, %v5540_v47  ;;  %v2011_v40 = vmax.f32 %v1933_v8, 0.0 }
 0x45e   : > { %v1935_v45 = vpop.f32.mrf.mxu1 }
 0x45f   : > { %v1936_v34 = vadd.f32 %v1935_v45, %v5540_v47  ;;  %v2014_v39 = vmax.f32 %v1944_v33, 0.0 }
 0x461   : > { %v2012_v41 = vmax.f32 %v1936_v34, 0.0  ;;  %v2036_v24 = vpack.c.bf16 %v2014_v39, %v2013_v42 }
 0x463   : > { %v2035_v44 = vpack.c.bf16 %v2012_v41, %v2011_v40 }
 0x465   : > { %4079 = vmatprep.mubr.bf16.mxu1 %v2035_v44 }
 0x466   : > { %4080 = vmatmul.mubr.bf16.gmra.mxu1 %v2036_v24 }
 0x468   : > { %v4037_v4 = vpop.f32.mrf.mxu1 }
 0x469   : > { %v1957_v59 = vadd.f32 %v4037_v4, %v5540_v47 }
 0x46a   : > { %v1948_v54 = vpop.f32.mrf.mxu1 }
 0x46b   : > { %v1949_v17 = vadd.f32 %v1948_v54, %v5540_v47  ;;  %v2017_v0 = vmax.f32 %v1957_v59, 0.0 }
 0x46c   : > { %v4038_v50 = vpop.f32.mrf.mxu1 }
 0x46d   : > { %v1960_v51 = vadd.f32 %v4038_v50, %v5540_v47  ;;  %v2015_v63 = vmax.f32 %v1949_v17, 0.0 }
 0x46e   : > { %v1951_v57 = vpop.f32.mrf.mxu1 }
 0x46f   : > { %v1952_v37 = vadd.f32 %v1951_v57, %v5540_v47  ;;  %v2018_v62 = vmax.f32 %v1960_v51, 0.0 }
 0x471   : > { %v2016_v46 = vmax.f32 %v1952_v37, 0.0  ;;  %v2038_v2 = vpack.c.bf16 %v2018_v62, %v2017_v0 }
 0x473   : > { %v2037_v52 = vpack.c.bf16 %v2016_v46, %v2015_v63 }
 0x475   : > { %4083 = vmatprep.mubr.bf16.mxu1 %v2037_v52 }
 0x476   : > { %4084 = vmatmul.mubr.bf16.gmra.mxu1 %v2038_v2 }
 0x477   : > { %v4041_v38 = vpop.f32.mrf.mxu1 }
 0x478   : > { %v1973_v6 = vadd.f32 %v4041_v38, %v5540_v47 }
 0x479   : > { %v1964_v3 = vpop.f32.mrf.mxu1 }
 0x47a   : > { %v1965_v5 = vadd.f32 %v1964_v3, %v5540_v47  ;;  %v2021_v11 = vmax.f32 %v1973_v6, 0.0 }
 0x47b   : > { %v4042_v49 = vpop.f32.mrf.mxu1 }
 0x47c   : > { %v1976_v15 = vadd.f32 %v4042_v49, %v5540_v47  ;;  %v2019_v31 = vmax.f32 %v1965_v5, 0.0 }
 0x47d   : > { %v1967_v1 = vpop.f32.mrf.mxu1 }
 0x47e   : > { %v1968_v56 = vadd.f32 %v1967_v1, %v5540_v47  ;;  %v2022_v10 = vmax.f32 %v1976_v15, 0.0 }
 0x480   : > { %v2020_v7 = vmax.f32 %v1968_v56, 0.0  ;;  %v2040_v13 = vpack.c.bf16 %v2022_v10, %v2021_v11 }
 0x482   : > { %v2039_v12 = vpack.c.bf16 %v2020_v7, %v2019_v31 }
 0x484   : > { %4087 = vmatprep.mubr.bf16.mxu1 %v2039_v12 }
 0x485   : > { %4088 = vmatmul.mubr.bf16.gmra.mxu1 %v2040_v13 }
 0x487   : > { %v4045_v14 = vpop.f32.mrf.mxu1 }
 0x488   : > { %v1989_v20 = vadd.f32 %v4045_v14, %v5540_v47 }
 0x489   : > { %v1980_v16 = vpop.f32.mrf.mxu1 }
 0x48a   : > { %v1981_v32 = vadd.f32 %v1980_v16, %v5540_v47  ;;  %v2025_v23 = vmax.f32 %v1989_v20, 0.0 }
 0x48b   : > { %v4046_v53 = vpop.f32.mrf.mxu1 }
 0x48c   : > { %v1992_v19 = vadd.f32 %v4046_v53, %v5540_v47  ;;  %v2023_v22 = vmax.f32 %v1981_v32, 0.0 }
 0x48d   : > { %v1983_v61 = vpop.f32.mrf.mxu1 }
 0x48e   : > { %v1984_v36 = vadd.f32 %v1983_v61, %v5540_v47  ;;  %v2026_v21 = vmax.f32 %v1992_v19, 0.0 }
 0x490   : > { %v2024_v35 = vmax.f32 %v1984_v36, 0.0  ;;  %v2042_v26 = vpack.c.bf16 %v2026_v21, %v2025_v23 }
 0x492   : > { %v2041_v25 = vpack.c.bf16 %v2024_v35, %v2023_v22 }
 0x494   : > { %4091 = vmatprep.mubr.bf16.mxu1 %v2041_v25 }
 0x495   : > { %4092 = vmatmul.mubr.bf16.gmra.mxu1 %v2042_v26 }
 0x4e6   : > { %v4065_v18 = vpop.f32.mrf.mxu1 }
 0x4e7   : > { %v2154_v33 = vadd.f32 %v4065_v18, %v5576_v29 }
 0x4e8   : > { %v2145_v9 = vpop.f32.mrf.mxu1 }
 0x4e9   : > { %v2146_v8 = vadd.f32 %v2145_v9, %v5576_v29  ;;  %v2274_v41 = vmax.f32 %v2154_v33, 0.0 }
 0x4ea   : > { %v4066_v30 = vpop.f32.mrf.mxu1 }
 0x4eb   : > { %v2157_v47 = vadd.f32 %v4066_v30, %v5576_v29  ;;  %v2272_v39 = vmax.f32 %v2146_v8, 0.0 }
 0x4ec   : > { %v2148_v58 = vpop.f32.mrf.mxu1 }
 0x4ed   : > { %v2149_v45 = vadd.f32 %v2148_v58, %v5576_v29  ;;  %v2275_v34 = vmax.f32 %v2157_v47, 0.0 }
 0x4ef   : > { %v2273_v40 = vmax.f32 %v2149_v45, 0.0  ;;  %v2305_v44 = vpack.c.bf16 %v2275_v34, %v2274_v41 }
 0x4f1   : > { %v2304_v42 = vpack.c.bf16 %v2273_v40, %v2272_v39 }
 0x4f3   : > { %4111 = vmatprep.mubr.bf16.mxu0 %v2304_v42 }
 0x4f4   : > { %4112 = vmatmul.mubr.bf16.vlgmr.msra.gmra.mxu0 %v2305_v44 }
 0x4f6   : > { %v4069_v24 = vpop.f32.mrf.mxu1 }
 0x4f7   : > { %v2170_v50 = vadd.f32 %v4069_v24, %v5576_v29 }
 0x4f8   : > { %v2161_v48 = vpop.f32.mrf.mxu1 }
 0x4f9   : > { %v2162_v54 = vadd.f32 %v2161_v48, %v5576_v29  ;;  %v2278_v37 = vmax.f32 %v2170_v50, 0.0 }
 0x4fa   : > { %v4070_v4 = vpop.f32.mrf.mxu1 }
 0x4fb   : > { %v2173_v55 = vadd.f32 %v4070_v4, %v5576_v29  ;;  %v2276_v57 = vmax.f32 %v2162_v54, 0.0 }
 0x4fc   : > { %v2164_v17 = vpop.f32.mrf.mxu1 }
 0x4fd   : > { %v2165_v51 = vadd.f32 %v2164_v17, %v5576_v29  ;;  %v2279_v59 = vmax.f32 %v2173_v55, 0.0 }
 0x4ff   : > { %v2277_v60 = vmax.f32 %v2165_v51, 0.0  ;;  %v2307_v63 = vpack.c.bf16 %v2279_v59, %v2278_v37 }
 0x501   : > { %v2306_v62 = vpack.c.bf16 %v2277_v60, %v2276_v57 }
 0x503   : > { %4115 = vmatprep.mubr.bf16.mxu0 %v2306_v62 }
 0x504   : > { %4116 = vmatmul.mubr.bf16.gmra.mxu0 %v2307_v63 }
 0x506   : > { %v4073_v46 = vpop.f32.mrf.mxu1 }
 0x507   : > { %v2186_v3 = vadd.f32 %v4073_v46, %v5576_v29 }
 0x508   : > { %v2177_v0 = vpop.f32.mrf.mxu1 }
 0x509   : > { %v2178_v2 = vadd.f32 %v2177_v0, %v5576_v29  ;;  %v2282_v56 = vmax.f32 %v2186_v3, 0.0 }
 0x50a   : > { %v4074_v52 = vpop.f32.mrf.mxu1 }
 0x50b   : > { %v2189_v38 = vadd.f32 %v4074_v52, %v5576_v29  ;;  %v2280_v6 = vmax.f32 %v2178_v2, 0.0 }
 0x50c   : > { %v2180_v49 = vpop.f32.mrf.mxu1 }
 0x50d   : > { %v2181_v5 = vadd.f32 %v2180_v49, %v5576_v29  ;;  %v2283_v15 = vmax.f32 %v2189_v38, 0.0 }
 0x50f   : > { %v2281_v1 = vmax.f32 %v2181_v5, 0.0  ;;  %v2309_v31 = vpack.c.bf16 %v2283_v15, %v2282_v56 }
 0x511   : > { %v2308_v10 = vpack.c.bf16 %v2281_v1, %v2280_v6 }
 0x513   : > { %4119 = vmatprep.mubr.bf16.mxu0 %v2308_v10 }
 0x514   : > { %4120 = vmatmul.mubr.bf16.gmra.mxu0 %v2309_v31 }
 0x516   : > { %v4077_v7 = vpop.f32.mrf.mxu1 }
 0x517   : > { %v2202_v16 = vadd.f32 %v4077_v7, %v5576_v29 }
 0x518   : > { %v2193_v11 = vpop.f32.mrf.mxu1 }
 0x519   : > { %v2194_v13 = vadd.f32 %v2193_v11, %v5576_v29  ;;  %v2286_v36 = vmax.f32 %v2202_v16, 0.0 }
 0x51a   : > { %v4078_v12 = vpop.f32.mrf.mxu1 }
 0x51b   : > { %v2205_v14 = vadd.f32 %v4078_v12, %v5576_v29  ;;  %v2284_v20 = vmax.f32 %v2194_v13, 0.0 }
 0x51c   : > { %v2196_v53 = vpop.f32.mrf.mxu1 }
 0x51d   : > { %v2197_v32 = vadd.f32 %v2196_v53, %v5576_v29  ;;  %v2287_v19 = vmax.f32 %v2205_v14, 0.0 }
 0x51f   : > { %v2285_v61 = vmax.f32 %v2197_v32, 0.0  ;;  %v2311_v22 = vpack.c.bf16 %v2287_v19, %v2286_v36 }
 0x521   : > { %v2310_v21 = vpack.c.bf16 %v2285_v61, %v2284_v20  ;;  %v2338_v20 = vsub.s32 6, %v5071_v43 }
 0x523   : > { %4123 = vmatprep.mubr.bf16.mxu0 %v2310_v21  ;;  %v5612_v61 = vrot.slane %v5537_v27, %v2338_v20 }
 0x524   : > { %4124 = vmatmul.mubr.bf16.gmra.mxu0 %v2311_v22 }
 0x526   : > { %v4081_v35 = vpop.f32.mrf.mxu1 }
 0x527   : > { %v2218_v18 = vadd.f32 %v4081_v35, %v5576_v29 }
 0x528   : > { %v2209_v23 = vpop.f32.mrf.mxu1 }
 0x529   : > { %v2210_v26 = vadd.f32 %v2209_v23, %v5576_v29  ;;  %v2290_v58 = vmax.f32 %v2218_v18, 0.0 }
 0x52a   : > { %v4082_v25 = vpop.f32.mrf.mxu1 }
 0x52b   : > { %v2221_v28 = vadd.f32 %v4082_v25, %v5576_v29  ;;  %v2288_v47 = vmax.f32 %v2210_v26, 0.0 }
 0x52c   : > { %v2212_v9 = vpop.f32.mrf.mxu1 }
 0x52d   : > { %v2213_v30 = vadd.f32 %v2212_v9, %v5576_v29  ;;  %v2291_v8 = vmax.f32 %v2221_v28, 0.0 }
 0x52f   : > { %v2289_v33 = vmax.f32 %v2213_v30, 0.0  ;;  %v2313_v34 = vpack.c.bf16 %v2291_v8, %v2290_v58 }
 0x531   : > { %v2312_v45 = vpack.c.bf16 %v2289_v33, %v2288_v47 }
 0x533   : > { %4127 = vmatprep.mubr.bf16.mxu0 %v2312_v45 }
 0x534   : > { %4128 = vmatmul.mubr.bf16.gmra.mxu0 %v2313_v34 }
 0x536   : > { %v4085_v39 = vpop.f32.mrf.mxu1 }
 0x537   : > { %v2234_v24 = vadd.f32 %v4085_v39, %v5576_v29 }
 0x538   : > { %v2225_v40 = vpop.f32.mrf.mxu1 }
 0x539   : > { %v2226_v42 = vadd.f32 %v2225_v40, %v5576_v29  ;;  %v2294_v17 = vmax.f32 %v2234_v24, 0.0 }
 0x53a   : > { %v4086_v41 = vpop.f32.mrf.mxu1 }
 0x53b   : > { %v2237_v44 = vadd.f32 %v4086_v41, %v5576_v29  ;;  %v2292_v55 = vmax.f32 %v2226_v42, 0.0 }
 0x53c   : > { %v2228_v48 = vpop.f32.mrf.mxu1 }
 0x53d   : > { %v2229_v4 = vadd.f32 %v2228_v48, %v5576_v29  ;;  %v2295_v54 = vmax.f32 %v2237_v44, 0.0 }
 0x53f   : > { %v2293_v50 = vmax.f32 %v2229_v4, 0.0  ;;  %v2315_v59 = vpack.c.bf16 %v2295_v54, %v2294_v17 }
 0x541   : > { %v2314_v51 = vpack.c.bf16 %v2293_v50, %v2292_v55 }
 0x543   : > { %4131 = vmatprep.mubr.bf16.mxu0 %v2314_v51 }
 0x544   : > { %4132 = vmatmul.mubr.bf16.gmra.mxu0 %v2315_v59 }
 0x545   : > { %v4089_v57 = vpop.f32.mrf.mxu1 }
 0x546   : > { %v2250_v46 = vadd.f32 %v4089_v57, %v5576_v29 }
 0x547   : > { %v2241_v60 = vpop.f32.mrf.mxu1 }
 0x548   : > { %v2242_v62 = vadd.f32 %v2241_v60, %v5576_v29  ;;  %v2298_v49 = vmax.f32 %v2250_v46, 0.0 }
 0x549   : > { %v4090_v37 = vpop.f32.mrf.mxu1 }
 0x54a   : > { %v2253_v63 = vadd.f32 %v4090_v37, %v5576_v29  ;;  %v2296_v38 = vmax.f32 %v2242_v62, 0.0 }
 0x54b   : > { %v2244_v0 = vpop.f32.mrf.mxu1 }
 0x54c   : > { %v2245_v52 = vadd.f32 %v2244_v0, %v5576_v29  ;;  %v2299_v2 = vmax.f32 %v2253_v63, 0.0 }
 0x54e   : > { %v2297_v3 = vmax.f32 %v2245_v52, 0.0  ;;  %v2317_v15 = vpack.c.bf16 %v2299_v2, %v2298_v49 }
 0x550   : > { %v2316_v5 = vpack.c.bf16 %v2297_v3, %v2296_v38 }
 0x552   : > { %4135 = vmatprep.mubr.bf16.mxu0 %v2316_v5 }
 0x553   : > { %4136 = vmatmul.mubr.bf16.gmra.mxu0 %v2317_v15 }
 0x555   : > { %v4093_v6 = vpop.f32.mrf.mxu1 }
 0x556   : > { %v2266_v7 = vadd.f32 %v4093_v6, %v5576_v29 }
 0x557   : > { %v2257_v1 = vpop.f32.mrf.mxu1 }
 0x558   : > { %v2258_v10 = vadd.f32 %v2257_v1, %v5576_v29  ;;  %v2302_v53 = vmax.f32 %v2266_v7, 0.0 }
 0x559   : > { %v4094_v56 = vpop.f32.mrf.mxu1 }
 0x55a   : > { %v2269_v31 = vadd.f32 %v4094_v56, %v5576_v29  ;;  %v2300_v14 = vmax.f32 %v2258_v10, 0.0 }
 0x55b   : > { %v2260_v11 = vpop.f32.mrf.mxu1 }
 0x55c   : > { %v2261_v12 = vadd.f32 %v2260_v11, %v5576_v29  ;;  %v2303_v13 = vmax.f32 %v2269_v31, 0.0 }
 0x55e   : > { %v2301_v16 = vmax.f32 %v2261_v12, 0.0  ;;  %v2319_v19 = vpack.c.bf16 %v2303_v13, %v2302_v53 }
 0x560   : > { %v2318_v32 = vpack.c.bf16 %v2301_v16, %v2300_v14 }
 0x562   : > { %4139 = vmatprep.mubr.bf16.mxu0 %v2318_v32 }
 0x563   : > { %4140 = vmatmul.mubr.bf16.gmra.mxu0 %v2319_v19 }
 0x5b4   : > { %v4113_v36 = vpop.f32.mrf.mxu0 }
 0x5b5   : > { %v2431_v29 = vadd.f32 %v4113_v36, %v5612_v61 }
 0x5b6   : > { %v2422_v21 = vpop.f32.mrf.mxu0 }
 0x5b7   : > { %v3672_v22 = vpack.c.bf16 %v2431_v29, %v2431_v29  ;;  %v2423_v35 = vadd.f32 %v2422_v21, %v5612_v61 }
 0x5b8   : > { %v4114_v23 = vpop.f32.mrf.mxu0 }
 0x5b9   : > { %3143 = vst [vmem:[%s5190_s17 + $0x2c] sm:$0xf] %v3672_v22  ;;  %v3670_v25 = vpack.c.bf16 %v2423_v35, %v2423_v35  ;;  %v2434_v26 = vadd.f32 %v4114_v23, %v5612_v61 }
 0x5ba   : > { %v2425_v28 = vpop.f32.mrf.mxu0 }
 0x5bb   : > { %3141 = vst [vmem:[%s5190_s17 + $0xc] sm:$0xf] %v3670_v25  ;;  %v3673_v43 = vpack.c.bf16 %v2434_v26, %v2434_v26  ;;  %v2426_v27 = vadd.f32 %v2425_v28, %v5612_v61 }
 0x5bd   : > { %3144 = vst [vmem:[%s5190_s17 + $0x3c] sm:$0xf] %v3673_v43  ;;  %v3671_v18 = vpack.c.bf16 %v2426_v27, %v2426_v27 }
 0x5bf   : > { %3142 = vst [vmem:[%s5190_s17 + $0x1c] sm:$0xf] %v3671_v18 }
 0x5c4   : > { %v4117_v9 = vpop.f32.mrf.mxu0 }
 0x5c5   : > { %v2447_v30 = vadd.f32 %v4117_v9, %v5612_v61 }
 0x5c6   : > { %v2438_v8 = vpop.f32.mrf.mxu0 }
 0x5c7   : > { %v3676_v47 = vpack.c.bf16 %v2447_v30, %v2447_v30  ;;  %v2439_v33 = vadd.f32 %v2438_v8, %v5612_v61 }
 0x5c8   : > { %v4118_v58 = vpop.f32.mrf.mxu0 }
 0x5c9   : > { %3147 = vst [vmem:[%s5190_s17 + $0x6c] sm:$0xf] %v3676_v47  ;;  %v3674_v45 = vpack.c.bf16 %v2439_v33, %v2439_v33  ;;  %v2450_v34 = vadd.f32 %v4118_v58, %v5612_v61 }
 0x5ca   : > { %v2441_v39 = vpop.f32.mrf.mxu0 }
 0x5cb   : > { %3145 = vst [vmem:[%s5190_s17 + $0x4c] sm:$0xf] %v3674_v45  ;;  %v3677_v40 = vpack.c.bf16 %v2450_v34, %v2450_v34  ;;  %v2442_v41 = vadd.f32 %v2441_v39, %v5612_v61 }
 0x5cd   : > { %3148 = vst [vmem:[%s5190_s17 + $0x7c] sm:$0xf] %v3677_v40  ;;  %v3675_v42 = vpack.c.bf16 %v2442_v41, %v2442_v41 }
 0x5cf   : > { %3146 = vst [vmem:[%s5190_s17 + $0x5c] sm:$0xf] %v3675_v42 }
 0x5d4   : > { %v4121_v44 = vpop.f32.mrf.mxu0 }
 0x5d5   : > { %v2463_v24 = vadd.f32 %v4121_v44, %v5612_v61 }
 0x5d6   : > { %v2454_v48 = vpop.f32.mrf.mxu0 }
 0x5d7   : > { %v3680_v4 = vpack.c.bf16 %v2463_v24, %v2463_v24  ;;  %v2455_v54 = vadd.f32 %v2454_v48, %v5612_v61 }
 0x5d8   : > { %v4122_v55 = vpop.f32.mrf.mxu0 }
 0x5d9   : > { %3151 = vst [vmem:[%s5190_s17 + $0xac] sm:$0xf] %v3680_v4  ;;  %v3678_v50 = vpack.c.bf16 %v2455_v54, %v2455_v54  ;;  %v2466_v17 = vadd.f32 %v4122_v55, %v5612_v61 }
 0x5da   : > { %v2457_v51 = vpop.f32.mrf.mxu0 }
 0x5db   : > { %3149 = vst [vmem:[%s5190_s17 + $0x8c] sm:$0xf] %v3678_v50  ;;  %v3681_v59 = vpack.c.bf16 %v2466_v17, %v2466_v17  ;;  %v2458_v57 = vadd.f32 %v2457_v51, %v5612_v61 }
 0x5dd   : > { %3152 = vst [vmem:[%s5190_s17 + $0xbc] sm:$0xf] %v3681_v59  ;;  %v3679_v60 = vpack.c.bf16 %v2458_v57, %v2458_v57 }
 0x5df   : > { %3150 = vst [vmem:[%s5190_s17 + $0x9c] sm:$0xf] %v3679_v60 }
 0x5e4   : > { %v4125_v37 = vpop.f32.mrf.mxu0 }
 0x5e5   : > { %v2479_v62 = vadd.f32 %v4125_v37, %v5612_v61 }
 0x5e6   : > { %v2470_v63 = vpop.f32.mrf.mxu0 }
 0x5e7   : > { %v3684_v46 = vpack.c.bf16 %v2479_v62, %v2479_v62  ;;  %v2471_v0 = vadd.f32 %v2470_v63, %v5612_v61 }
 0x5e8   : > { %v4126_v52 = vpop.f32.mrf.mxu0 }
 0x5e9   : > { %3155 = vst [vmem:[%s5190_s17 + $0xec] sm:$0xf] %v3684_v46  ;;  %v3682_v2 = vpack.c.bf16 %v2471_v0, %v2471_v0  ;;  %v2482_v38 = vadd.f32 %v4126_v52, %v5612_v61 }
 0x5ea   : > { %v2473_v3 = vpop.f32.mrf.mxu0 }
 0x5eb   : > { %3153 = vst [vmem:[%s5190_s17 + $0xcc] sm:$0xf] %v3682_v2  ;;  %v3685_v49 = vpack.c.bf16 %v2482_v38, %v2482_v38  ;;  %v2474_v5 = vadd.f32 %v2473_v3, %v5612_v61 }
 0x5ed   : > { %3156 = vst [vmem:[%s5190_s17 + $0xfc] sm:$0xf] %v3685_v49  ;;  %v3683_v15 = vpack.c.bf16 %v2474_v5, %v2474_v5 }
 0x5ef   : > { %3154 = vst [vmem:[%s5190_s17 + $0xdc] sm:$0xf] %v3683_v15 }
 0x5f4   : > { %v4129_v6 = vpop.f32.mrf.mxu0 }
 0x5f5   : > { %v2495_v1 = vadd.f32 %v4129_v6, %v5612_v61 }
 0x5f6   : > { %v2486_v56 = vpop.f32.mrf.mxu0 }
 0x5f7   : > { %v3688_v10 = vpack.c.bf16 %v2495_v1, %v2495_v1  ;;  %v2487_v31 = vadd.f32 %v2486_v56, %v5612_v61 }
 0x5f8   : > { %v4130_v7 = vpop.f32.mrf.mxu0 }
 0x5f9   : > { %3159 = vst [vmem:[%s5190_s17 + $0x12c] sm:$0xf] %v3688_v10  ;;  %v3686_v11 = vpack.c.bf16 %v2487_v31, %v2487_v31  ;;  %v2498_v12 = vadd.f32 %v4130_v7, %v5612_v61 }
 0x5fa   : > { %v2489_v13 = vpop.f32.mrf.mxu0 }
 0x5fb   : > { %3157 = vst [vmem:[%s5190_s17 + $0x10c] sm:$0xf] %v3686_v11  ;;  %v3689_v14 = vpack.c.bf16 %v2498_v12, %v2498_v12  ;;  %v2490_v16 = vadd.f32 %v2489_v13, %v5612_v61 }
 0x5fd   : > { %3160 = vst [vmem:[%s5190_s17 + $0x13c] sm:$0xf] %v3689_v14  ;;  %v3687_v53 = vpack.c.bf16 %v2490_v16, %v2490_v16 }
 0x5ff   : > { %3158 = vst [vmem:[%s5190_s17 + $0x11c] sm:$0xf] %v3687_v53 }
 0x604   : > { %v4133_v32 = vpop.f32.mrf.mxu0 }
 0x605   : > { %v2511_v19 = vadd.f32 %v4133_v32, %v5612_v61 }
 0x606   : > { %v2502_v20 = vpop.f32.mrf.mxu0 }
 0x607   : > { %v3692_v36 = vpack.c.bf16 %v2511_v19, %v2511_v19  ;;  %v2503_v29 = vadd.f32 %v2502_v20, %v5612_v61 }
 0x608   : > { %v4134_v21 = vpop.f32.mrf.mxu0 }
 0x609   : > { %3163 = vst [vmem:[%s5190_s17 + $0x16c] sm:$0xf] %v3692_v36  ;;  %v3690_v22 = vpack.c.bf16 %v2503_v29, %v2503_v29  ;;  %v2514_v35 = vadd.f32 %v4134_v21, %v5612_v61 }
 0x60a   : > { %v2505_v23 = vpop.f32.mrf.mxu0 }
 0x60b   : > { %3161 = vst [vmem:[%s5190_s17 + $0x14c] sm:$0xf] %v3690_v22  ;;  %v3693_v25 = vpack.c.bf16 %v2514_v35, %v2514_v35  ;;  %v2506_v26 = vadd.f32 %v2505_v23, %v5612_v61 }
 0x60d   : > { %3164 = vst [vmem:[%s5190_s17 + $0x17c] sm:$0xf] %v3693_v25  ;;  %v3691_v28 = vpack.c.bf16 %v2506_v26, %v2506_v26 }
 0x60f   : > { %3162 = vst [vmem:[%s5190_s17 + $0x15c] sm:$0xf] %v3691_v28 }
 0x613   : > { %v4137_v43 = vpop.f32.mrf.mxu0 }
 0x614   : > { %v2527_v27 = vadd.f32 %v4137_v43, %v5612_v61 }
 0x615   : > { %v2518_v18 = vpop.f32.mrf.mxu0 }
 0x616   : > { %v3696_v9 = vpack.c.bf16 %v2527_v27, %v2527_v27  ;;  %v2519_v30 = vadd.f32 %v2518_v18, %v5612_v61 }
 0x617   : > { %v4138_v8 = vpop.f32.mrf.mxu0 }
 0x618   : > { %3167 = vst [vmem:[%s5190_s17 + $0x1ac] sm:$0xf] %v3696_v9  ;;  %v3694_v47 = vpack.c.bf16 %v2519_v30, %v2519_v30  ;;  %v2530_v33 = vadd.f32 %v4138_v8, %v5612_v61 }
 0x619   : > { %v2521_v58 = vpop.f32.mrf.mxu0 }
 0x61a   : > { %3165 = vst [vmem:[%s5190_s17 + $0x18c] sm:$0xf] %v3694_v47  ;;  %v3697_v45 = vpack.c.bf16 %v2530_v33, %v2530_v33  ;;  %v2522_v34 = vadd.f32 %v2521_v58, %v5612_v61 }
 0x61c   : > { %3168 = vst [vmem:[%s5190_s17 + $0x1bc] sm:$0xf] %v3697_v45  ;;  %v3695_v39 = vpack.c.bf16 %v2522_v34, %v2522_v34 }
 0x61e   : > { %3166 = vst [vmem:[%s5190_s17 + $0x19c] sm:$0xf] %v3695_v39 }
 0x623   : > { %v4141_v40 = vpop.f32.mrf.mxu0 }
 0x624   : > { %v2543_v41 = vadd.f32 %v4141_v40, %v5612_v61 }
 0x625   : > { %v2534_v42 = vpop.f32.mrf.mxu0 }
 0x626   : > { %v3700_v44 = vpack.c.bf16 %v2543_v41, %v2543_v41  ;;  %v2535_v24 = vadd.f32 %v2534_v42, %v5612_v61 }
 0x627   : > { %v4142_v48 = vpop.f32.mrf.mxu0 }
 0x628   : > { %3171 = vst [vmem:[%s5190_s17 + $0x1ec] sm:$0xf] %v3700_v44  ;;  %v3698_v4 = vpack.c.bf16 %v2535_v24, %v2535_v24  ;;  %v2546_v54 = vadd.f32 %v4142_v48, %v5612_v61 }
 0x629   : > { %v2537_v55 = vpop.f32.mrf.mxu0 }
 0x62a   : > { %3169 = vst [vmem:[%s5190_s17 + $0x1cc] sm:$0xf] %v3698_v4  ;;  %v3701_v50 = vpack.c.bf16 %v2546_v54, %v2546_v54  ;;  %v2538_v17 = vadd.f32 %v2537_v55, %v5612_v61 }
 0x62c   : > { %3172 = vst [vmem:[%s5190_s17 + $0x1fc] sm:$0xf] %v3701_v50  ;;  %v3699_v51 = vpack.c.bf16 %v2538_v17, %v2538_v17 }
 0x62e   : > { %3170 = vst [vmem:[%s5190_s17 + $0x1dc] sm:$0xf] %v3699_v51 }
 0x62f   : > { %4648 = shalt.err (!%p4645_p11)
}
 0x630   : > { %s4649_s16 = scalar_lea.hbm %s5681_s2, 8192  ;;  %s4653_s29 = scalar_lea.hbm %s5737_s9, 16384 }
 0x631   : > { %p4650_p10 = scmp.ne.s32.totalorder %s5681_s2, %s4649_s16  ;;  %p4654_p8 = scmp.lt.s32.totalorder %s5681_s2, %s5737_s9 }
 0x632   : > { %p4655_p9 = scmp.lt.s32.totalorder %s4653_s29, %s4649_s16 }
 0x633   : > { %p4651_p0 = pnand %p4650_p10, %p5776_p2 }
 0x634   : > { %p4656_p4 = por %p4655_p9, %p4654_p8 }
 0x635   : > { %p4652_p5 = pneg %p4651_p0 }
 0x637   : > { %p4657_p13 = pnand %p4656_p4, %p4652_p5 }
 0x639   : > { %4660 = shalt.err (!%p4657_p13)
}
 0x63a   : > { %s4735_s3 = smov 256   ;;  %s4736_s27 = smov 16  }
 0x63b   : > { %4187 = dma.vmem_to_hbm [thread:$0]  (%p5776_p2), %s5683_s5, 8192, %s5681_s2, %s3174_s15, %s4735_s3, %s4735_s3, %s4736_s27  }
 0x63c PF: > { %s3203_s21 = sand.u32 1, %s4707_s30   ;;  %p5777_p1 = scmp.ne.s32.totalorder %s5762_s26, 0 }
 0x63d   : > { %p5778_p6 = scmp.ge.s32.totalorder %s4719_s12, 2  ;;  %s3204_s24 = scalar_lea.sflag [#allocation4], %s3203_s21 }
 0x63f   : > { %p4216_p12 = pnand %p5778_p6, %p5777_p1 }
 0x641   : > { %p4217_p7 = pneg %p4216_p12 }
 0x643   : > { %4702 = dma.done.wait (%p4217_p7), %s3204_s24, 8192  }
 0x644   : > { %4704 = vsyncadd (%p4217_p7), %s3204_s24, 4294959104  ;;  %p28_p3 = scmp.ge.s32.totalorder %s4905_s22, 4   ;;  %s5779_s30 = smov %s4711_s10 }
 0x645   : > { %s5780_s10 = smov %s4715_s11  ;;  %s5781_s11 = smov %s4916_s14 }
 0x646   : > { %s5782_s12 = smov %s4905_s22  ;;  %30 = sbr.rel (!%p28_p3) target bundleno = 17 (0x11), region = 138 }
 0x64b   :  { %3209 = vsyncpa [#allocation3], 1 }
 0x64c   :  { %3211 = vsyncpa [#allocation3 + $0x1], 1 }
 0x64d   :  { %3212 = vsyncpa [#allocation6], 1 }
 0x64e   :  { %3214 = vsyncpa [#allocation6 + $0x1], 1 }
 0x64f   :  { %3215 = vsyncpa [#allocation9], 1 }
 0x650   :  { %3216 = vsyncpa [#allocation12], 1 }
 0x651   :  { %3217 = vsyncpa [#allocation15], 1 }
 0x652   :  { %3218 = vsyncpa [#allocation4], 1 }
 0x653   :  { %3220 = vsyncpa [#allocation4 + $0x1], 1 }

</bundles_post_ra>
